<compile_context>
chip_gen: v6e
topology: v6e:2x2x1
jax: 0.10.0
libtpu: 0.0.40
codegen_flags: <defaults>
</compile_context>

<pallas_src>
import functools

import jax
import jax.numpy as jnp
from jax.experimental import pallas as pl
from jax.experimental.pallas import tpu as pltpu

BN_EPS = 1e-5
_VMEM_LIMIT = 64 * 1024 * 1024


# --------------------------------------------------------------------------
# Kernel 1: conv1x1_down (BN folded) + ReLU + axial positional embedding add
# --------------------------------------------------------------------------
def _pw_down_kernel(x_ref, w_ref, b_ref, pos_ref, o_ref):
    x = x_ref[...].astype(jnp.bfloat16)                        # (tile, Cin)
    acc = jnp.dot(x, w_ref[...], preferred_element_type=jnp.float32)
    y = jnp.maximum(acc + b_ref[...], 0.0)                     # folded BN bias, ReLU
    o_ref[...] = (y + pos_ref[...]).astype(o_ref.dtype)        # + positional embedding


def _pw_conv_down(x_tok, w_bf16, b, pos_tok, *, tile):
    T, Cin = x_tok.shape
    Cout = w_bf16.shape[1]
    tile = min(tile, T)
    assert T % tile == 0
    cost = pl.CostEstimate(
        flops=2 * T * Cin * Cout,
        transcendentals=0,
        bytes_accessed=x_tok.size * 4 + w_bf16.size * 2 + b.size * 4
        + pos_tok.size * 4 + T * Cout * 4,
    )
    return pl.pallas_call(
        _pw_down_kernel,
        out_shape=jax.ShapeDtypeStruct((T, Cout), jnp.float32),
        grid_spec=pltpu.PrefetchScalarGridSpec(
            num_scalar_prefetch=0,
            grid=(T // tile,),
            in_specs=[
                pl.BlockSpec((tile, Cin), lambda i: (i, 0)),
                pl.BlockSpec((Cin, Cout), lambda i: (0, 0)),
                pl.BlockSpec((1, Cout), lambda i: (0, 0)),
                pl.BlockSpec((tile, Cout), lambda i: (i, 0)),
            ],
            out_specs=pl.BlockSpec((tile, Cout), lambda i: (i, 0)),
        ),
        compiler_params=pltpu.CompilerParams(
            dimension_semantics=("parallel",),
            vmem_limit_bytes=_VMEM_LIMIT),
        cost_estimate=cost,
    )(x_tok, w_bf16, b, pos_tok)


# --------------------------------------------------------------------------
# Kernel 2: fused multi-head self-attention over one axis
#   input block: (nb, T, D) sequences; QKV projection, softmax attention,
#   output projection (+bias), all in one kernel.
# --------------------------------------------------------------------------
def _self_attn_kernel(x_ref, wq_ref, wkv_ref, wo_ref, bo_ref, o_ref, *,
                      heads, dim_heads):
    nb, T, D = x_ref.shape
    x2 = x_ref[...].astype(jnp.bfloat16).reshape(nb * T, D)    # (nb*T, D)
    wq = wq_ref[...]
    wkv = wkv_ref[...]
    wo = wo_ref[...]
    scale = dim_heads ** -0.5

    acc = jnp.zeros((nb * T, D), jnp.float32)
    for h in range(heads):                                     # static, small
        lo, hi = h * dim_heads, (h + 1) * dim_heads
        qh = jnp.dot(x2, wq[:, lo:hi], preferred_element_type=jnp.float32)
        kh = jnp.dot(x2, wkv[:, lo:hi], preferred_element_type=jnp.float32)
        vh = jnp.dot(x2, wkv[:, D + lo:D + hi], preferred_element_type=jnp.float32)
        qh = qh.reshape(nb, T, dim_heads)
        kh = kh.reshape(nb, T, dim_heads)
        vh = vh.reshape(nb, T, dim_heads)

        dots = jnp.einsum('bie,bje->bij', qh, kh,
                          preferred_element_type=jnp.float32) * scale
        dots = dots - jnp.max(dots, axis=-1, keepdims=True)
        p = jnp.exp(dots)
        p = p / jnp.sum(p, axis=-1, keepdims=True)
        oh = jnp.einsum('bij,bje->bie', p, vh,
                        preferred_element_type=jnp.float32)
        # concat over heads then @Wo  ==  sum_h (oh @ Wo[rows of head h])
        acc = acc + jnp.dot(oh.reshape(nb * T, dim_heads).astype(jnp.bfloat16),
                            wo[lo:hi, :], preferred_element_type=jnp.float32)

    out = acc + bo_ref[...]
    o_ref[...] = out.reshape(nb, T, D).astype(o_ref.dtype)


def _self_attention(x, wq, wkv, wo, bo, *, heads, block):
    N, T, D = x.shape
    e = D // heads
    block = min(block, N)
    assert N % block == 0
    kern = functools.partial(_self_attn_kernel, heads=heads, dim_heads=e)
    cost = pl.CostEstimate(
        flops=2 * N * T * D * (4 * D) + 4 * N * heads * T * T * e,
        transcendentals=N * heads * T * T,
        bytes_accessed=2 * N * T * D * 4
        + (wq.size + wkv.size + wo.size) * 2 + bo.size * 4,
    )
    return pl.pallas_call(
        kern,
        out_shape=jax.ShapeDtypeStruct((N, T, D), jnp.float32),
        grid_spec=pltpu.PrefetchScalarGridSpec(
            num_scalar_prefetch=0,
            grid=(N // block,),
            in_specs=[
                pl.BlockSpec((block, T, D), lambda i: (i, 0, 0)),
                pl.BlockSpec((D, D), lambda i: (0, 0)),
                pl.BlockSpec((D, 2 * D), lambda i: (0, 0)),
                pl.BlockSpec((D, D), lambda i: (0, 0)),
                pl.BlockSpec((1, D), lambda i: (0, 0)),
            ],
            out_specs=pl.BlockSpec((block, T, D), lambda i: (i, 0, 0)),
        ),
        compiler_params=pltpu.CompilerParams(
            dimension_semantics=("parallel",),
            vmem_limit_bytes=_VMEM_LIMIT),
        cost_estimate=cost,
    )(x, wq.astype(jnp.bfloat16), wkv.astype(jnp.bfloat16),
      wo.astype(jnp.bfloat16), bo.reshape(1, D))


# --------------------------------------------------------------------------
# Kernel 3: relu -> conv1x1_up (BN folded) -> + residual -> relu
# --------------------------------------------------------------------------
def _pw_up_kernel(y_ref, res_ref, w_ref, b_ref, o_ref):
    y = jnp.maximum(y_ref[...], 0.0).astype(jnp.bfloat16)      # ReLU before conv_up
    acc = jnp.dot(y, w_ref[...], preferred_element_type=jnp.float32)
    out = acc + b_ref[...] + res_ref[...]                      # folded BN bias + identity
    o_ref[...] = jnp.maximum(out, 0.0).astype(o_ref.dtype)     # final ReLU


def _pw_conv_up(y_tok, res_tok, w_bf16, b, *, tile):
    T, Cin = y_tok.shape
    Cout = w_bf16.shape[1]
    tile = min(tile, T)
    assert T % tile == 0
    cost = pl.CostEstimate(
        flops=2 * T * Cin * Cout,
        transcendentals=0,
        bytes_accessed=y_tok.size * 4 + res_tok.size * 4 + w_bf16.size * 2
        + b.size * 4 + T * Cout * 4,
    )
    return pl.pallas_call(
        _pw_up_kernel,
        out_shape=jax.ShapeDtypeStruct((T, Cout), jnp.float32),
        grid_spec=pltpu.PrefetchScalarGridSpec(
            num_scalar_prefetch=0,
            grid=(T // tile,),
            in_specs=[
                pl.BlockSpec((tile, Cin), lambda i: (i, 0)),
                pl.BlockSpec((tile, Cout), lambda i: (i, 0)),
                pl.BlockSpec((Cin, Cout), lambda i: (0, 0)),
                pl.BlockSpec((1, Cout), lambda i: (0, 0)),
            ],
            out_specs=pl.BlockSpec((tile, Cout), lambda i: (i, 0)),
        ),
        compiler_params=pltpu.CompilerParams(
            dimension_semantics=("parallel",),
            vmem_limit_bytes=_VMEM_LIMIT),
        cost_estimate=cost,
    )(y_tok, res_tok, w_bf16, b)


# --------------------------------------------------------------------------
# Full AxialBlock forward (wrapper: BN folding + layout plumbing between kernels)
# --------------------------------------------------------------------------
def axial_block_forward(x, p, *, heads, tile_tokens=256, attn_block=8):
    B, Cin, H, W = x.shape
    width = p['w_down'].shape[1]
    Cout = p['w_up'].shape[1]
    assert Cout == Cin, "residual needs inplanes == planes*expansion (no downsample)"

    # fold eval-mode BatchNorm into the (bias-free) 1x1 convs, weights -> bf16
    s1 = p['bn1_gamma'] * jax.lax.rsqrt(p['bn1_var'] + BN_EPS)
    w_down = (p['w_down'] * s1[None, :]).astype(jnp.bfloat16)
    b_down = (p['bn1_beta'] - p['bn1_mean'] * s1).reshape(1, width)

    s2 = p['bn2_gamma'] * jax.lax.rsqrt(p['bn2_var'] + BN_EPS)
    w_up = (p['w_up'] * s2[None, :]).astype(jnp.bfloat16)
    b_up = (p['bn2_beta'] - p['bn2_mean'] * s2).reshape(1, Cout)

    # token-major layout (B*H*W, C): channels on the lane axis
    x_tok = x.transpose(0, 2, 3, 1).reshape(B * H * W, Cin)

    # axial positional embedding broadcast to the token layout
    pos = (p['pos0'] + p['pos1'])[0]                                   # (width, H, W)
    pos_tok = jnp.broadcast_to(jnp.transpose(pos, (1, 2, 0))[None],
                               (B, H, W, width)).reshape(B * H * W, width)

    # conv_down + bn1 + relu + pos-emb
    t = _pw_conv_down(x_tok, w_down, b_down, pos_tok,
                      tile=tile_tokens).reshape(B, H, W, width)

    # axial attention along H  (PermuteToFrom permutation [0, 3, 2, 1])
    a = t.transpose(0, 2, 1, 3).reshape(B * W, H, width)
    a = _self_attention(a, p['attn_h']['wq'], p['attn_h']['wkv'],
                        p['attn_h']['wo'], p['attn_h']['bo'],
                        heads=heads, block=attn_block)
    t = a.reshape(B, W, H, width).transpose(0, 2, 1, 3)

    # axial attention along W  (PermuteToFrom permutation [0, 2, 3, 1])
    a = t.reshape(B * H, W, width)
    a = _self_attention(a, p['attn_w']['wq'], p['attn_w']['wkv'],
                        p['attn_w']['wo'], p['attn_w']['bo'],
                        heads=heads, block=attn_block)
    t = a.reshape(B, H, W, width)

    # relu + conv_up + bn2 + residual + relu
    y_tok = t.reshape(B * H * W, width)
    out_tok = _pw_conv_up(y_tok, x_tok, w_up, b_up, tile=tile_tokens)
    return out_tok.reshape(B, H, W, Cout).transpose(0, 3, 1, 2)


# --------------------------------------------------------------------------
# Pure-JAX reference (f32, mirrors the PyTorch module exactly)
# --------------------------------------------------------------------------
def _self_attention_ref(x, wq, wkv, wo, bo, heads):
    N, T, D = x.shape
    e = D // heads
    q = x @ wq
    kv = x @ wkv
    k, v = kv[..., :D], kv[..., D:]
    mh = lambda z: z.reshape(N, T, heads, e).transpose(0, 2, 1, 3)
    qh, kh, vh = mh(q), mh(k), mh(v)
    dots = jnp.einsum('nhie,nhje->nhij', qh, kh) * (e ** -0.5)
    pa = jax.nn.softmax(dots, axis=-1)
    o = jnp.einsum('nhij,nhje->nhie', pa, vh)
    o = o.transpose(0, 2, 1, 3).reshape(N, T, D)
    return o @ wo + bo


def axial_block_ref(x, p, *, heads):
    B, Cin, H, W = x.shape
    width = p['w_down'].shape[1]
    t = jnp.einsum('bchw,cd->bdhw', x, p['w_down'])
    s1 = p['bn1_gamma'] / jnp.sqrt(p['bn1_var'] + BN_EPS)
    t = t * s1[None, :, None, None] + (p['bn1_beta'] - p['bn1_mean'] * s1)[None, :, None, None]
    t = jnp.maximum(t, 0.0)
    t = t + p['pos0'] + p['pos1']
    # attention along H: permutation [0,3,2,1] (self-inverse)
    a = jnp.transpose(t, (0, 3, 2, 1)).reshape(B * W, H, width)
    a = _self_attention_ref(a, p['attn_h']['wq'], p['attn_h']['wkv'],
                            p['attn_h']['wo'], p['attn_h']['bo'], heads)
    t = jnp.transpose(a.reshape(B, W, H, width), (0, 3, 2, 1))
    # attention along W: permutation [0,2,3,1], inverse [0,3,1,2]
    a = jnp.transpose(t, (0, 2, 3, 1)).reshape(B * H, W, width)
    a = _self_attention_ref(a, p['attn_w']['wq'], p['attn_w']['wkv'],
                            p['attn_w']['wo'], p['attn_w']['bo'], heads)
    t = jnp.transpose(a.reshape(B, H, W, width), (0, 3, 1, 2))
    t = jnp.maximum(t, 0.0)
    u = jnp.einsum('bchw,cd->bdhw', t, p['w_up'])
    s2 = p['bn2_gamma'] / jnp.sqrt(p['bn2_var'] + BN_EPS)
    u = u * s2[None, :, None, None] + (p['bn2_beta'] - p['bn2_mean'] * s2)[None, :, None, None]
    u = u + x
    return jnp.maximum(u, 0.0)


if __name__ == "__main__":
    # AxialBlock(inplanes=8, planes=4, groups=2, img_size=(16,16)):
    # width = 4, conv_up -> planes*expansion = 8 == inplanes so the residual works.
    B, INPLANES, H, W = 2, 8, 16, 16
    PLANES, GROUPS = 4, 2
    WIDTH = PLANES                      # planes * base_width / 64
    COUT = PLANES * 2                   # expansion = 2

    key = jax.random.PRNGKey(0)
    ks = jax.random.split(key, 20)
    x = jax.random.normal(ks[0], (B, INPLANES, H, W), dtype=jnp.float32)

    def linear(k, fan_in, shape):
        return jax.random.normal(k, shape, dtype=jnp.float32) / jnp.sqrt(fan_in)

    p = {
        'w_down': linear(ks[1], INPLANES, (INPLANES, WIDTH)),
        'bn1_gamma': 1.0 + 0.1 * jax.random.normal(ks[2], (WIDTH,), jnp.float32),
        'bn1_beta': 0.1 * jax.random.normal(ks[3], (WIDTH,), jnp.float32),
        'bn1_mean': 0.1 * jax.random.normal(ks[4], (WIDTH,), jnp.float32),
        'bn1_var': 0.8 + 0.2 * jax.random.uniform(ks[5], (WIDTH,), jnp.float32),
        'pos0': jax.random.normal(ks[6], (1, WIDTH, H, 1), jnp.float32),
        'pos1': jax.random.normal(ks[7], (1, WIDTH, 1, W), jnp.float32),
        'attn_h': {
            'wq': linear(ks[8], WIDTH, (WIDTH, WIDTH)),
            'wkv': linear(ks[9], WIDTH, (WIDTH, 2 * WIDTH)),
            'wo': linear(ks[10], WIDTH, (WIDTH, WIDTH)),
            'bo': 0.01 * jax.random.normal(ks[11], (WIDTH,), jnp.float32),
        },
        'attn_w': {
            'wq': linear(ks[12], WIDTH, (WIDTH, WIDTH)),
            'wkv': linear(ks[13], WIDTH, (WIDTH, 2 * WIDTH)),
            'wo': linear(ks[14], WIDTH, (WIDTH, WIDTH)),
            'bo': 0.01 * jax.random.normal(ks[15], (WIDTH,), jnp.float32),
        },
        'w_up': linear(ks[16], WIDTH, (WIDTH, COUT)),
        'bn2_gamma': 1.0 + 0.1 * jax.random.normal(ks[17], (COUT,), jnp.float32),
        'bn2_beta': 0.1 * jax.random.normal(ks[18], (COUT,), jnp.float32),
        'bn2_mean': 0.1 * jax.random.normal(ks[19], (COUT,), jnp.float32),
        'bn2_var': jnp.ones((COUT,), jnp.float32),
    }

    fwd = jax.jit(functools.partial(axial_block_forward, heads=GROUPS,
                                    tile_tokens=256, attn_block=8))
    out = jax.block_until_ready(fwd(x, p))

    ref = axial_block_ref(x, p, heads=GROUPS)
    assert out.shape == (B, COUT, H, W)
    # bf16 MXU operands in the kernel vs f32 reference -> loosened tolerance.
    assert jnp.allclose(out, ref, atol=1e-1, rtol=1e-1), "mismatch vs reference"

    print("KERNEL_OK")
</pallas_src>

<mosaic_0001>
module attributes {stable_mosaic.version = 11 : i64} {
  func.func @_pw_down_kernel(%arg0: i32, %arg1: memref<256x8xf32, #tpu.memory_space<vmem>>, %arg2: memref<8x4xbf16, #tpu.memory_space<vmem>>, %arg3: memref<1x4xf32, #tpu.memory_space<vmem>>, %arg4: memref<256x4xf32, #tpu.memory_space<vmem>>, %arg5: memref<256x4xf32, #tpu.memory_space<vmem>>) attributes {dimension_semantics = [#tpu.dimension_semantics<parallel>], iteration_bounds = array<i64: 2>, scalar_prefetch = 0 : i64, scratch_operands = 0 : i64, tpu.core_type = #tpu.core_type<tc>, window_params = [{transform_indices = @transform_0, window_bounds = array<i64: 256, 8>}, {pipeline_mode = #tpu.pipeline_mode<synchronous>, transform_indices = @transform_1, window_bounds = array<i64: 8, 4>}, {pipeline_mode = #tpu.pipeline_mode<synchronous>, transform_indices = @transform_2, window_bounds = array<i64: 1, 4>}, {transform_indices = @transform_3, window_bounds = array<i64: 256, 4>}, {transform_indices = @transform_4, window_bounds = array<i64: 256, 4>}]} {
    %c0 = arith.constant 0 : index
    %c0_0 = arith.constant 0 : index
    %0 = vector.load %arg1[%c0, %c0_0] : memref<256x8xf32, #tpu.memory_space<vmem>>, vector<256x8xf32>
    %1 = arith.truncf %0 : vector<256x8xf32> to vector<256x8xbf16>
    %c0_1 = arith.constant 0 : index
    %c0_2 = arith.constant 0 : index
    %2 = vector.load %arg2[%c0_1, %c0_2] : memref<8x4xbf16, #tpu.memory_space<vmem>>, vector<8x4xbf16>
    %cst = arith.constant dense<0.000000e+00> : vector<256x4xf32>
    %3 = tpu.matmul %1, %2, %cst {dimension_numbers = #tpu.dot_dimension_numbers<[1], [0], [0], [1], [0, 0, 1, 1], [], []>} : vector<256x8xbf16>, vector<8x4xbf16>, vector<256x4xf32> -> vector<256x4xf32>
    %c0_3 = arith.constant 0 : index
    %c0_4 = arith.constant 0 : index
    %4 = vector.load %arg3[%c0_3, %c0_4] : memref<1x4xf32, #tpu.memory_space<vmem>>, vector<1x4xf32>
    %5 = vector.broadcast %4 : vector<1x4xf32> to vector<256x4xf32>
    %6 = arith.addf %3, %5 : vector<256x4xf32>
    %cst_5 = arith.constant 0.000000e+00 : f32
    %7 = vector.broadcast %cst_5 : f32 to vector<256x4xf32>
    %8 = arith.maximumf %6, %7 : vector<256x4xf32>
    %c0_6 = arith.constant 0 : index
    %c0_7 = arith.constant 0 : index
    %9 = vector.load %arg4[%c0_6, %c0_7] : memref<256x4xf32, #tpu.memory_space<vmem>>, vector<256x4xf32>
    %10 = arith.addf %8, %9 : vector<256x4xf32>
    %c0_8 = arith.constant 0 : index
    %c0_9 = arith.constant 0 : index
    %11 = vector.load %arg5[%c0_8, %c0_9] : memref<256x4xf32, #tpu.memory_space<vmem>>, vector<256x4xf32>
    tpu.vector_store %arg5[%c0_8, %c0_9], %10 {strides = array<i32>} : memref<256x4xf32, #tpu.memory_space<vmem>>, vector<256x4xf32>,
    return
  }
  func.func @transform_0(%arg0: i32) -> (i32, i32) {
    %c0_i32 = arith.constant 0 : i32
    %c0_i32_0 = arith.constant 0 : i32
    return %arg0, %c0_i32 : i32, i32
  }
  func.func @transform_1(%arg0: i32) -> (i32, i32) {
    %c0_i32 = arith.constant 0 : i32
    %c0_i32_0 = arith.constant 0 : i32
    %c0_i32_1 = arith.constant 0 : i32
    return %c0_i32, %c0_i32_0 : i32, i32
  }
  func.func @transform_2(%arg0: i32) -> (i32, i32) {
    %c0_i32 = arith.constant 0 : i32
    %c0_i32_0 = arith.constant 0 : i32
    %c0_i32_1 = arith.constant 0 : i32
    return %c0_i32, %c0_i32_0 : i32, i32
  }
  func.func @transform_3(%arg0: i32) -> (i32, i32) {
    %c0_i32 = arith.constant 0 : i32
    %c0_i32_0 = arith.constant 0 : i32
    return %arg0, %c0_i32 : i32, i32
  }
  func.func @transform_4(%arg0: i32) -> (i32, i32) {
    %c0_i32 = arith.constant 0 : i32
    %c0_i32_0 = arith.constant 0 : i32
    return %arg0, %c0_i32 : i32, i32
  }
}

module attributes {stable_mosaic.version = 11 : i64} {
  func.func @_pw_up_kernel(%arg0: i32, %arg1: memref<256x4xf32, #tpu.memory_space<vmem>>, %arg2: memref<256x8xf32, #tpu.memory_space<vmem>>, %arg3: memref<4x8xbf16, #tpu.memory_space<vmem>>, %arg4: memref<1x8xf32, #tpu.memory_space<vmem>>, %arg5: memref<256x8xf32, #tpu.memory_space<vmem>>) attributes {dimension_semantics = [#tpu.dimension_semantics<parallel>], iteration_bounds = array<i64: 2>, scalar_prefetch = 0 : i64, scratch_operands = 0 : i64, tpu.core_type = #tpu.core_type<tc>, window_params = [{transform_indices = @transform_0, window_bounds = array<i64: 256, 4>}, {transform_indices = @transform_1, window_bounds = array<i64: 256, 8>}, {pipeline_mode = #tpu.pipeline_mode<synchronous>, transform_indices = @transform_2, window_bounds = array<i64: 4, 8>}, {pipeline_mode = #tpu.pipeline_mode<synchronous>, transform_indices = @transform_3, window_bounds = array<i64: 1, 8>}, {transform_indices = @transform_4, window_bounds = array<i64: 256, 8>}]} {
    %c0 = arith.constant 0 : index
    %c0_0 = arith.constant 0 : index
    %0 = vector.load %arg1[%c0, %c0_0] : memref<256x4xf32, #tpu.memory_space<vmem>>, vector<256x4xf32>
    %cst = arith.constant 0.000000e+00 : f32
    %1 = vector.broadcast %cst : f32 to vector<256x4xf32>
    %2 = arith.maximumf %0, %1 : vector<256x4xf32>
    %3 = arith.truncf %2 : vector<256x4xf32> to vector<256x4xbf16>
    %c0_1 = arith.constant 0 : index
    %c0_2 = arith.constant 0 : index
    %4 = vector.load %arg3[%c0_1, %c0_2] : memref<4x8xbf16, #tpu.memory_space<vmem>>, vector<4x8xbf16>
    %cst_3 = arith.constant dense<0.000000e+00> : vector<256x8xf32>
    %5 = tpu.matmul %3, %4, %cst_3 {dimension_numbers = #tpu.dot_dimension_numbers<[1], [0], [0], [1], [0, 0, 1, 1], [], []>} : vector<256x4xbf16>, vector<4x8xbf16>, vector<256x8xf32> -> vector<256x8xf32>
    %c0_4 = arith.constant 0 : index
    %c0_5 = arith.constant 0 : index
    %6 = vector.load %arg4[%c0_4, %c0_5] : memref<1x8xf32, #tpu.memory_space<vmem>>, vector<1x8xf32>
    %7 = vector.broadcast %6 : vector<1x8xf32> to vector<256x8xf32>
    %8 = arith.addf %5, %7 : vector<256x8xf32>
    %c0_6 = arith.constant 0 : index
    %c0_7 = arith.constant 0 : index
    %9 = vector.load %arg2[%c0_6, %c0_7] : memref<256x8xf32, #tpu.memory_space<vmem>>, vector<256x8xf32>
    %10 = arith.addf %8, %9 : vector<256x8xf32>
    %cst_8 = arith.constant 0.000000e+00 : f32
    %11 = vector.broadcast %cst_8 : f32 to vector<256x8xf32>
    %12 = arith.maximumf %10, %11 : vector<256x8xf32>
    %c0_9 = arith.constant 0 : index
    %c0_10 = arith.constant 0 : index
    %13 = vector.load %arg5[%c0_9, %c0_10] : memref<256x8xf32, #tpu.memory_space<vmem>>, vector<256x8xf32>
    tpu.vector_store %arg5[%c0_9, %c0_10], %12 {strides = array<i32>} : memref<256x8xf32, #tpu.memory_space<vmem>>, vector<256x8xf32>,
    return
  }
  func.func @transform_0(%arg0: i32) -> (i32, i32) {
    %c0_i32 = arith.constant 0 : i32
    %c0_i32_0 = arith.constant 0 : i32
    return %arg0, %c0_i32 : i32, i32
  }
  func.func @transform_1(%arg0: i32) -> (i32, i32) {
    %c0_i32 = arith.constant 0 : i32
    %c0_i32_0 = arith.constant 0 : i32
    return %arg0, %c0_i32 : i32, i32
  }
  func.func @transform_2(%arg0: i32) -> (i32, i32) {
    %c0_i32 = arith.constant 0 : i32
    %c0_i32_0 = arith.constant 0 : i32
    %c0_i32_1 = arith.constant 0 : i32
    return %c0_i32, %c0_i32_0 : i32, i32
  }
  func.func @transform_3(%arg0: i32) -> (i32, i32) {
    %c0_i32 = arith.constant 0 : i32
    %c0_i32_0 = arith.constant 0 : i32
    %c0_i32_1 = arith.constant 0 : i32
    return %c0_i32, %c0_i32_0 : i32, i32
  }
  func.func @transform_4(%arg0: i32) -> (i32, i32) {
    %c0_i32 = arith.constant 0 : i32
    %c0_i32_0 = arith.constant 0 : i32
    return %arg0, %c0_i32 : i32, i32
  }
}

module attributes {stable_mosaic.version = 11 : i64} {
  func.func @_self_attn_kernel(%arg0: i32, %arg1: memref<8x16x4xf32, #tpu.memory_space<vmem>>, %arg2: memref<4x4xbf16, #tpu.memory_space<vmem>>, %arg3: memref<4x8xbf16, #tpu.memory_space<vmem>>, %arg4: memref<4x4xbf16, #tpu.memory_space<vmem>>, %arg5: memref<1x4xf32, #tpu.memory_space<vmem>>, %arg6: memref<8x16x4xf32, #tpu.memory_space<vmem>>) attributes {dimension_semantics = [#tpu.dimension_semantics<parallel>], iteration_bounds = array<i64: 4>, scalar_prefetch = 0 : i64, scratch_operands = 0 : i64, tpu.core_type = #tpu.core_type<tc>, window_params = [{transform_indices = @transform_0, window_bounds = array<i64: 8, 16, 4>}, {pipeline_mode = #tpu.pipeline_mode<synchronous>, transform_indices = @transform_1, window_bounds = array<i64: 4, 4>}, {pipeline_mode = #tpu.pipeline_mode<synchronous>, transform_indices = @transform_2, window_bounds = array<i64: 4, 8>}, {pipeline_mode = #tpu.pipeline_mode<synchronous>, transform_indices = @transform_3, window_bounds = array<i64: 4, 4>}, {pipeline_mode = #tpu.pipeline_mode<synchronous>, transform_indices = @transform_4, window_bounds = array<i64: 1, 4>}, {transform_indices = @transform_5, window_bounds = array<i64: 8, 16, 4>}]} {
    %c0 = arith.constant 0 : index
    %c0_0 = arith.constant 0 : index
    %c0_1 = arith.constant 0 : index
    %0 = vector.load %arg1[%c0, %c0_0, %c0_1] : memref<8x16x4xf32, #tpu.memory_space<vmem>>, vector<8x16x4xf32>
    %1 = arith.truncf %0 : vector<8x16x4xf32> to vector<8x16x4xbf16>
    %2 = vector.shape_cast %1 : vector<8x16x4xbf16> to vector<128x4xbf16>
    %c0_2 = arith.constant 0 : index
    %c0_3 = arith.constant 0 : index
    %3 = vector.load %arg2[%c0_2, %c0_3] : memref<4x4xbf16, #tpu.memory_space<vmem>>, vector<4x4xbf16>
    %c0_4 = arith.constant 0 : index
    %c0_5 = arith.constant 0 : index
    %4 = vector.load %arg3[%c0_4, %c0_5] : memref<4x8xbf16, #tpu.memory_space<vmem>>, vector<4x8xbf16>
    %c0_6 = arith.constant 0 : index
    %c0_7 = arith.constant 0 : index
    %5 = vector.load %arg4[%c0_6, %c0_7] : memref<4x4xbf16, #tpu.memory_space<vmem>>, vector<4x4xbf16>
    %cst = arith.constant 0.000000e+00 : f32
    %6 = vector.broadcast %cst : f32 to vector<128x4xf32>
    %7 = vector.extract_strided_slice %3 {offsets = [0, 0], sizes = [4, 2], strides = [1, 1]} : vector<4x4xbf16> to vector<4x2xbf16>
    %cst_8 = arith.constant dense<0.000000e+00> : vector<128x2xf32>
    %8 = tpu.matmul %2, %7, %cst_8 {dimension_numbers = #tpu.dot_dimension_numbers<[1], [0], [0], [1], [0, 0, 1, 1], [], []>} : vector<128x4xbf16>, vector<4x2xbf16>, vector<128x2xf32> -> vector<128x2xf32>
    %9 = vector.extract_strided_slice %4 {offsets = [0, 0], sizes = [4, 2], strides = [1, 1]} : vector<4x8xbf16> to vector<4x2xbf16>
    %cst_9 = arith.constant dense<0.000000e+00> : vector<128x2xf32>
    %10 = tpu.matmul %2, %9, %cst_9 {dimension_numbers = #tpu.dot_dimension_numbers<[1], [0], [0], [1], [0, 0, 1, 1], [], []>} : vector<128x4xbf16>, vector<4x2xbf16>, vector<128x2xf32> -> vector<128x2xf32>
    %11 = vector.extract_strided_slice %4 {offsets = [0, 4], sizes = [4, 2], strides = [1, 1]} : vector<4x8xbf16> to vector<4x2xbf16>
    %cst_10 = arith.constant dense<0.000000e+00> : vector<128x2xf32>
    %12 = tpu.matmul %2, %11, %cst_10 {dimension_numbers = #tpu.dot_dimension_numbers<[1], [0], [0], [1], [0, 0, 1, 1], [], []>} : vector<128x4xbf16>, vector<4x2xbf16>, vector<128x2xf32> -> vector<128x2xf32>
    %13 = vector.shape_cast %8 : vector<128x2xf32> to vector<8x16x2xf32>
    %14 = vector.shape_cast %10 : vector<128x2xf32> to vector<8x16x2xf32>
    %15 = vector.shape_cast %12 : vector<128x2xf32> to vector<8x16x2xf32>
    "tpu.trace_start"() <{level = 10 : i32, message = "bie,bje->bij"}> : () -> ()
    %cst_11 = arith.constant dense<0.000000e+00> : vector<8x16x16xf32>
    %16 = tpu.matmul %13, %14, %cst_11 {dimension_numbers = #tpu.dot_dimension_numbers<[2], [2], [1], [1], [0, 0, 0, 1, 1, 1], [0], [0]>} : vector<8x16x2xf32>, vector<8x16x2xf32>, vector<8x16x16xf32> -> vector<8x16x16xf32>
    "tpu.trace_stop"() : () -> ()
    %cst_12 = arith.constant 0.707106769 : f32
    %17 = vector.broadcast %cst_12 : f32 to vector<8x16x16xf32>
    %18 = arith.mulf %16, %17 : vector<8x16x16xf32>
    %cst_13 = arith.constant dense<0xFF800000> : vector<8x16xf32>
    %19 = vector.multi_reduction <maximumf>, %18, %cst_13 [2] : vector<8x16x16xf32> to vector<8x16xf32>
    %20 = vector.shape_cast %19 : vector<8x16xf32> to vector<8x16x1xf32>
    %21 = vector.broadcast %20 : vector<8x16x1xf32> to vector<8x16x16xf32>
    %22 = arith.subf %18, %21 : vector<8x16x16xf32>
    %23 = math.exp %22 : vector<8x16x16xf32>
    %cst_14 = arith.constant dense<0.000000e+00> : vector<8x16xf32>
    %24 = vector.multi_reduction <add>, %23, %cst_14 [2] : vector<8x16x16xf32> to vector<8x16xf32>
    %25 = vector.shape_cast %24 : vector<8x16xf32> to vector<8x16x1xf32>
    %26 = vector.broadcast %25 : vector<8x16x1xf32> to vector<8x16x16xf32>
    %27 = arith.divf %23, %26 : vector<8x16x16xf32>
    "tpu.trace_start"() <{level = 10 : i32, message = "bij,bje->bie"}> : () -> ()
    %cst_15 = arith.constant dense<0.000000e+00> : vector<8x16x2xf32>
    %28 = tpu.matmul %27, %15, %cst_15 {dimension_numbers = #tpu.dot_dimension_numbers<[2], [1], [1], [2], [0, 0, 0, 1, 1, 2], [0], [0]>} : vector<8x16x16xf32>, vector<8x16x2xf32>, vector<8x16x2xf32> -> vector<8x16x2xf32>
    "tpu.trace_stop"() : () -> ()
    %29 = vector.shape_cast %28 : vector<8x16x2xf32> to vector<128x2xf32>
    %30 = arith.truncf %29 : vector<128x2xf32> to vector<128x2xbf16>
    %31 = vector.extract_strided_slice %5 {offsets = [0, 0], sizes = [2, 4], strides = [1, 1]} : vector<4x4xbf16> to vector<2x4xbf16>
    %cst_16 = arith.constant dense<0.000000e+00> : vector<128x4xf32>
    %32 = tpu.matmul %30, %31, %cst_16 {dimension_numbers = #tpu.dot_dimension_numbers<[1], [0], [0], [1], [0, 0, 1, 1], [], []>} : vector<128x2xbf16>, vector<2x4xbf16>, vector<128x4xf32> -> vector<128x4xf32>
    %33 = arith.addf %6, %32 : vector<128x4xf32>
    %34 = vector.extract_strided_slice %3 {offsets = [0, 2], sizes = [4, 2], strides = [1, 1]} : vector<4x4xbf16> to vector<4x2xbf16>
    %cst_17 = arith.constant dense<0.000000e+00> : vector<128x2xf32>
    %35 = tpu.matmul %2, %34, %cst_17 {dimension_numbers = #tpu.dot_dimension_numbers<[1], [0], [0], [1], [0, 0, 1, 1], [], []>} : vector<128x4xbf16>, vector<4x2xbf16>, vector<128x2xf32> -> vector<128x2xf32>
    %36 = vector.extract_strided_slice %4 {offsets = [0, 2], sizes = [4, 2], strides = [1, 1]} : vector<4x8xbf16> to vector<4x2xbf16>
    %cst_18 = arith.constant dense<0.000000e+00> : vector<128x2xf32>
    %37 = tpu.matmul %2, %36, %cst_18 {dimension_numbers = #tpu.dot_dimension_numbers<[1], [0], [0], [1], [0, 0, 1, 1], [], []>} : vector<128x4xbf16>, vector<4x2xbf16>, vector<128x2xf32> -> vector<128x2xf32>
    %38 = vector.extract_strided_slice %4 {offsets = [0, 6], sizes = [4, 2], strides = [1, 1]} : vector<4x8xbf16> to vector<4x2xbf16>
    %cst_19 = arith.constant dense<0.000000e+00> : vector<128x2xf32>
    %39 = tpu.matmul %2, %38, %cst_19 {dimension_numbers = #tpu.dot_dimension_numbers<[1], [0], [0], [1], [0, 0, 1, 1], [], []>} : vector<128x4xbf16>, vector<4x2xbf16>, vector<128x2xf32> -> vector<128x2xf32>
    %40 = vector.shape_cast %35 : vector<128x2xf32> to vector<8x16x2xf32>
    %41 = vector.shape_cast %37 : vector<128x2xf32> to vector<8x16x2xf32>
    %42 = vector.shape_cast %39 : vector<128x2xf32> to vector<8x16x2xf32>
    "tpu.trace_start"() <{level = 10 : i32, message = "bie,bje->bij"}> : () -> ()
    %cst_20 = arith.constant dense<0.000000e+00> : vector<8x16x16xf32>
    %43 = tpu.matmul %40, %41, %cst_20 {dimension_numbers = #tpu.dot_dimension_numbers<[2], [2], [1], [1], [0, 0, 0, 1, 1, 1], [0], [0]>} : vector<8x16x2xf32>, vector<8x16x2xf32>, vector<8x16x16xf32> -> vector<8x16x16xf32>
    "tpu.trace_stop"() : () -> ()
    %cst_21 = arith.constant 0.707106769 : f32
    %44 = vector.broadcast %cst_21 : f32 to vector<8x16x16xf32>
    %45 = arith.mulf %43, %44 : vector<8x16x16xf32>
    %cst_22 = arith.constant dense<0xFF800000> : vector<8x16xf32>
    %46 = vector.multi_reduction <maximumf>, %45, %cst_22 [2] : vector<8x16x16xf32> to vector<8x16xf32>
    %47 = vector.shape_cast %46 : vector<8x16xf32> to vector<8x16x1xf32>
    %48 = vector.broadcast %47 : vector<8x16x1xf32> to vector<8x16x16xf32>
    %49 = arith.subf %45, %48 : vector<8x16x16xf32>
    %50 = math.exp %49 : vector<8x16x16xf32>
    %cst_23 = arith.constant dense<0.000000e+00> : vector<8x16xf32>
    %51 = vector.multi_reduction <add>, %50, %cst_23 [2] : vector<8x16x16xf32> to vector<8x16xf32>
    %52 = vector.shape_cast %51 : vector<8x16xf32> to vector<8x16x1xf32>
    %53 = vector.broadcast %52 : vector<8x16x1xf32> to vector<8x16x16xf32>
    %54 = arith.divf %50, %53 : vector<8x16x16xf32>
    "tpu.trace_start"() <{level = 10 : i32, message = "bij,bje->bie"}> : () -> ()
    %cst_24 = arith.constant dense<0.000000e+00> : vector<8x16x2xf32>
    %55 = tpu.matmul %54, %42, %cst_24 {dimension_numbers = #tpu.dot_dimension_numbers<[2], [1], [1], [2], [0, 0, 0, 1, 1, 2], [0], [0]>} : vector<8x16x16xf32>, vector<8x16x2xf32>, vector<8x16x2xf32> -> vector<8x16x2xf32>
    "tpu.trace_stop"() : () -> ()
    %56 = vector.shape_cast %55 : vector<8x16x2xf32> to vector<128x2xf32>
    %57 = arith.truncf %56 : vector<128x2xf32> to vector<128x2xbf16>
    %58 = vector.extract_strided_slice %5 {offsets = [2, 0], sizes = [2, 4], strides = [1, 1]} : vector<4x4xbf16> to vector<2x4xbf16>
    %cst_25 = arith.constant dense<0.000000e+00> : vector<128x4xf32>
    %59 = tpu.matmul %57, %58, %cst_25 {dimension_numbers = #tpu.dot_dimension_numbers<[1], [0], [0], [1], [0, 0, 1, 1], [], []>} : vector<128x2xbf16>, vector<2x4xbf16>, vector<128x4xf32> -> vector<128x4xf32>
    %60 = arith.addf %33, %59 : vector<128x4xf32>
    %c0_26 = arith.constant 0 : index
    %c0_27 = arith.constant 0 : index
    %61 = vector.load %arg5[%c0_26, %c0_27] : memref<1x4xf32, #tpu.memory_space<vmem>>, vector<1x4xf32>
    %62 = vector.broadcast %61 : vector<1x4xf32> to vector<128x4xf32>
    %63 = arith.addf %60, %62 : vector<128x4xf32>
    %64 = vector.shape_cast %63 : vector<128x4xf32> to vector<8x16x4xf32>
    %c0_28 = arith.constant 0 : index
    %c0_29 = arith.constant 0 : index
    %c0_30 = arith.constant 0 : index
    %65 = vector.load %arg6[%c0_28, %c0_29, %c0_30] : memref<8x16x4xf32, #tpu.memory_space<vmem>>, vector<8x16x4xf32>
    tpu.vector_store %arg6[%c0_28, %c0_29, %c0_30], %64 {strides = array<i32>} : memref<8x16x4xf32, #tpu.memory_space<vmem>>, vector<8x16x4xf32>,
    return
  }
  func.func @transform_0(%arg0: i32) -> (i32, i32, i32) {
    %c0_i32 = arith.constant 0 : i32
    %c0_i32_0 = arith.constant 0 : i32
    %c0_i32_1 = arith.constant 0 : i32
    return %arg0, %c0_i32, %c0_i32_0 : i32, i32, i32
  }
  func.func @transform_1(%arg0: i32) -> (i32, i32) {
    %c0_i32 = arith.constant 0 : i32
    %c0_i32_0 = arith.constant 0 : i32
    %c0_i32_1 = arith.constant 0 : i32
    return %c0_i32, %c0_i32_0 : i32, i32
  }
  func.func @transform_2(%arg0: i32) -> (i32, i32) {
    %c0_i32 = arith.constant 0 : i32
    %c0_i32_0 = arith.constant 0 : i32
    %c0_i32_1 = arith.constant 0 : i32
    return %c0_i32, %c0_i32_0 : i32, i32
  }
  func.func @transform_3(%arg0: i32) -> (i32, i32) {
    %c0_i32 = arith.constant 0 : i32
    %c0_i32_0 = arith.constant 0 : i32
    %c0_i32_1 = arith.constant 0 : i32
    return %c0_i32, %c0_i32_0 : i32, i32
  }
  func.func @transform_4(%arg0: i32) -> (i32, i32) {
    %c0_i32 = arith.constant 0 : i32
    %c0_i32_0 = arith.constant 0 : i32
    %c0_i32_1 = arith.constant 0 : i32
    return %c0_i32, %c0_i32_0 : i32, i32
  }
  func.func @transform_5(%arg0: i32) -> (i32, i32, i32) {
    %c0_i32 = arith.constant 0 : i32
    %c0_i32_0 = arith.constant 0 : i32
    %c0_i32_1 = arith.constant 0 : i32
    return %arg0, %c0_i32, %c0_i32_0 : i32, i32, i32
  }
}

</mosaic_0001>

<bundles_post_ra>
// kernel: axial_block_forward.4
= control target key start
LH: loop header
LB: loop body
LE: loop exit
PB: predicated region body
PF: predicated region fallthrough
CT: control target
= control target key end

     0   :  { %s817_s15 = smov 0   ;;  %s1032_s0 = inlined_call_operand.vmem [shape: f32[512,8], index: 0, kind: input, shape index: {}]   ;;  %s1033_s1 = inlined_call_operand.vmem [shape: bf16[8,4], index: 1, kind: input, shape index: {}]   ;;  %s1034_s2 = inlined_call_operand.vmem [shape: f32[1,4], index: 2, kind: input, shape index: {}]   ;;  %s1035_s3 = inlined_call_operand.vmem [shape: f32[512,4], index: 3, kind: input, shape index: {}]   ;;  %s1036_s4 = inlined_call_operand.vmem [shape: f32[512,4], index: 4, kind: output, shape index: {}]  }
   0x1 LB: > { %s691_s16 = sadd.s32 4294967295, %s790_s15   ;;  %p695_p0 = scmp.ge.s32.totalorder %s790_s15, 1  ;;  %s790_s15 = sphi %s817_s15, %s14_s15  }
   0x2   : > { %p174_p1 = scmp.lt.s32.totalorder %s790_s15, 3 }
   0x4   : > { %p175_p2 = pnand %p695_p0, %p174_p1 }
   0x5   : > { %s696_s19 = sshll.u32 (!%p175_p2), %s691_s16, 5 }
   0x6   : > { %178 = sbr.rel (%p175_p2) target bundleno = 249 (0xf9), region = 36  ;;  %p206_p3 = scmp.lt.s32.totalorder (!%p175_p2), %s696_s19, 63 }
   0xb   : > { %v272_v0 = vld [vmem:[%s1033_s1] sm:$0xf]  ;;  %vm329_vm0 = vcmask 1043456   ;;  %s1038_s19 = smov (!%p206_p3, %s696_s19), 63  ;;  %vm280_vm1 = vcmask 64512   ;;  %vm590_vm2 = vcmask 31744  }
   0xc   : > { %774 = vmatprep.subr.msk.bf16.mxu0 %vm329_vm0, %v272_v0  ;;  %775 = vmatprep.subr.msk.bf16.mxu1 %vm329_vm0, %v272_v0  ;;  %v331_v1 = vsel %vm329_vm0, %v272_v0, 0  ;;  %s828_s20 = sshll.u32 %s1038_s19, 3  ;;  %v887_v50 = vld [vmem:[%s1034_s2] ss:$0 sm:$0xff] }
   0xd   : > { %739 = vmatpush3.bf16.msra.mxu0 %v331_v1  ;;  %773 = vmatpush3.bf16.msra.mxu1 %v331_v1  ;;  %s834_s23 = scalar_lea.vmem %s1032_s0, %s828_s20  ;;  %s893_s28 = scalar_lea.vmem %s1035_s3, %s828_s20 }
   0xe   : > { %v224_v2 = vld [vmem:[%s834_s23] sm:$0xff]  ;;  %v225_v3 = vld [vmem:[%s834_s23 + $0x8] sm:$0xff]  ;;  %v226_v7 = vld [vmem:[%s834_s23 + $0x10] sm:$0xff]  ;;  %s904_s5 = scalar_lea.vmem %s1036_s4, %s828_s20 }
   0xf   : > { %v240_v4 = vld [vmem:[%s834_s23 + $0x80] sm:$0xff]  ;;  %v256_v5 = vpack.c.bf16 %v225_v3, %v224_v2  ;;  %v241_v6 = vld [vmem:[%s834_s23 + $0x88] sm:$0xff]  ;;  %v227_v8 = vld [vmem:[%s834_s23 + $0x18] sm:$0xff] }
  0x10   : > { %v264_v9 = vpack.c.bf16 %v241_v6, %v240_v4  ;;  %v257_v10 = vpack.c.bf16 %v227_v8, %v226_v7  ;;  %v242_v11 = vld [vmem:[%s834_s23 + $0x90] sm:$0xff]  ;;  %v243_v12 = vld [vmem:[%s834_s23 + $0x98] sm:$0xff]  ;;  %v228_v13 = vld [vmem:[%s834_s23 + $0x20] sm:$0xff] }
  0x11   : > { %740 = vmatprep.mubr.msk.bf16.mxu0 %vm280_vm1, %v256_v5  ;;  %v265_v14 = vpack.c.bf16 %v243_v12, %v242_v11  ;;  %v229_v15 = vld [vmem:[%s834_s23 + $0x28] sm:$0xff]  ;;  %v244_v16 = vld [vmem:[%s834_s23 + $0xa0] sm:$0xff]  ;;  %v230_v20 = vld [vmem:[%s834_s23 + $0x30] sm:$0xff] }
  0x12   : > { %v245_v17 = vld [vmem:[%s834_s23 + $0xa8] sm:$0xff]  ;;  %756 = vmatprep.mubr.msk.bf16.mxu1 %vm280_vm1, %v264_v9  ;;  %741 = vmatmul.mubr.msk.bf16.vlgmr.msra.gmra.mxu0 %vm280_vm1, %v257_v10  ;;  %v258_v18 = vpack.c.bf16 %v229_v15, %v228_v13  ;;  %v231_v21 = vld [vmem:[%s834_s23 + $0x38] sm:$0xff]  ;;  %v246_v22 = vld [vmem:[%s834_s23 + $0xb0] sm:$0xff] }
  0x13   : > { %v266_v19 = vpack.c.bf16 %v245_v17, %v244_v16  ;;  %757 = vmatmul.mubr.msk.bf16.vlgmr.msra.gmra.mxu1 %vm280_vm1, %v265_v14  ;;  %v247_v23 = vld [vmem:[%s834_s23 + $0xb8] sm:$0xff]  ;;  %v232_v24 = vld [vmem:[%s834_s23 + $0x40] sm:$0xff]  ;;  %v233_v25 = vld [vmem:[%s834_s23 + $0x48] sm:$0xff]  ;;  %v259_v28 = vpack.c.bf16 %v231_v21, %v230_v20 }
  0x14   : > { %744 = vmatprep.mubr.msk.bf16.mxu0 %vm280_vm1, %v258_v18  ;;  %v248_v26 = vld [vmem:[%s834_s23 + $0xc0] sm:$0xff]  ;;  %v249_v27 = vld [vmem:[%s834_s23 + $0xc8] sm:$0xff]  ;;  %v267_v29 = vpack.c.bf16 %v247_v23, %v246_v22  ;;  %v260_v30 = vpack.c.bf16 %v233_v25, %v232_v24  ;;  %v234_v32 = vld [vmem:[%s834_s23 + $0x50] sm:$0xff] }
  0x15   : > { %760 = vmatprep.mubr.msk.bf16.mxu1 %vm280_vm1, %v266_v19  ;;  %v268_v31 = vpack.c.bf16 %v249_v27, %v248_v26  ;;  %v235_v33 = vld [vmem:[%s834_s23 + $0x58] sm:$0xff]  ;;  %v250_v34 = vld [vmem:[%s834_s23 + $0xd0] sm:$0xff]  ;;  %v236_v36 = vld [vmem:[%s834_s23 + $0x60] sm:$0xff] }
  0x16   : > { %v251_v35 = vld [vmem:[%s834_s23 + $0xd8] sm:$0xff]  ;;  %v237_v37 = vld [vmem:[%s834_s23 + $0x68] sm:$0xff]  ;;  %v252_v38 = vld [vmem:[%s834_s23 + $0xe0] sm:$0xff]  ;;  %v261_v40 = vpack.c.bf16 %v235_v33, %v234_v32 }
  0x17   : > { %v253_v39 = vld [vmem:[%s834_s23 + $0xe8] sm:$0xff]  ;;  %v269_v41 = vpack.c.bf16 %v251_v35, %v250_v34  ;;  %v262_v42 = vpack.c.bf16 %v237_v37, %v236_v36  ;;  %v238_v44 = vld [vmem:[%s834_s23 + $0x70] sm:$0xff]  ;;  %v239_v45 = vld [vmem:[%s834_s23 + $0x78] sm:$0xff] }
  0x18   : > { %v270_v43 = vpack.c.bf16 %v253_v39, %v252_v38  ;;  %v254_v46 = vld [vmem:[%s834_s23 + $0xf0] sm:$0xff]  ;;  %v255_v47 = vld [vmem:[%s834_s23 + $0xf8] sm:$0xff]  ;;  %v263_v48 = vpack.c.bf16 %v239_v45, %v238_v44  ;;  %v526_v62 = vld [vmem:[%s893_s28] sm:$0xff] }
  0x19   : > { %v271_v49 = vpack.c.bf16 %v255_v47, %v254_v46  ;;  %v528_v54 = vld [vmem:[%s893_s28 + $0x10] sm:$0xff]  ;;  %v542_v3 = vld [vmem:[%s893_s28 + $0x80] sm:$0xff]  ;;  %v529_v8 = vld [vmem:[%s893_s28 + $0x18] sm:$0xff] }
  0x1a   : > { %745 = vmatmul.mubr.msk.bf16.gmra.mxu0 %vm280_vm1, %v259_v28  ;;  %v544_v58 = vld [vmem:[%s893_s28 + $0x90] sm:$0xff]  ;;  %v545_v13 = vld [vmem:[%s893_s28 + $0x98] sm:$0xff]  ;;  %v527_v18 = vld [vmem:[%s893_s28 + $0x8] sm:$0xff] }
  0x1b   : > { %761 = vmatmul.mubr.msk.bf16.gmra.mxu1 %vm280_vm1, %v267_v29  ;;  %748 = vmatprep.mubr.msk.bf16.mxu0 %vm280_vm1, %v260_v30  ;;  %v543_v23 = vld [vmem:[%s893_s28 + $0x88] sm:$0xff]  ;;  %v532_v28 = vld [vmem:[%s893_s28 + $0x30] sm:$0xff]  ;;  %v530_v38 = vld [vmem:[%s893_s28 + $0x20] sm:$0xff] }
  0x1c   : > { %764 = vmatprep.mubr.msk.bf16.mxu1 %vm280_vm1, %v268_v31  ;;  %v548_v33 = vld [vmem:[%s893_s28 + $0xb0] sm:$0xff] }
  0x22   : > { %749 = vmatmul.mubr.msk.bf16.gmra.mxu0 %vm280_vm1, %v261_v40 }
  0x23   : > { %765 = vmatmul.mubr.msk.bf16.gmra.mxu1 %vm280_vm1, %v269_v41  ;;  %752 = vmatprep.mubr.msk.bf16.mxu0 %vm280_vm1, %v262_v42 }
  0x24   : > { %768 = vmatprep.mubr.msk.bf16.mxu1 %vm280_vm1, %v270_v43  ;;  %v546_v43 = vld [vmem:[%s893_s28 + $0xa0] sm:$0xff] }
  0x2a   : > { %753 = vmatmul.mubr.msk.bf16.gmra.mxu0 %vm280_vm1, %v263_v48  ;;  %v533_v48 = vld [vmem:[%s893_s28 + $0x38] sm:$0xff] }
  0x2b   : > { %769 = vmatmul.mubr.msk.bf16.gmra.mxu1 %vm280_vm1, %v271_v49 }
  0xd2   : > { %v742_v51 = vpop.f32.mrf.mxu0 }
  0xd3   : > { %v376_v52 = vadd.f32 %v742_v51, %v887_v50  ;;  %v758_v53 = vpop.f32.mrf.mxu1 }
  0xd4   : > { %v440_v55 = vadd.f32 %v758_v53, %v887_v50  ;;  %v367_v56 = vpop.f32.mrf.mxu0 }
  0xd5   : > { %v496_v57 = vmax.f32 %v376_v52, 0.0  ;;  %v368_v59 = vadd.f32 %v887_v50, %v367_v56  ;;  %v431_v60 = vpop.f32.mrf.mxu1 }
  0xd6   : > { %v512_v61 = vmax.f32 %v440_v55, 0.0  ;;  %v432_v63 = vadd.f32 %v887_v50, %v431_v60  ;;  %v743_v0 = vpop.f32.mrf.mxu0 }
  0xd7   : > { %v560_v1 = vadd.f32 %v528_v54, %v496_v57  ;;  %v494_v2 = vmax.f32 %v368_v59, 0.0  ;;  %v379_v4 = vadd.f32 %v743_v0, %v887_v50  ;;  %v759_v5 = vpop.f32.mrf.mxu1  ;;  %v549_v54 = vld [vmem:[%s893_s28 + $0xb8] sm:$0xff]  ;;  %v531_v59 = vld [vmem:[%s893_s28 + $0x28] sm:$0xff] }
  0xd8   : > { %v576_v6 = vadd.f32 %v544_v58, %v512_v61  ;;  %v510_v7 = vmax.f32 %v432_v63, 0.0  ;;  %v443_v9 = vadd.f32 %v759_v5, %v887_v50  ;;  %v370_v10 = vpop.f32.mrf.mxu0  ;;  %v547_v0 = vld [vmem:[%s893_s28 + $0xa8] sm:$0xff]  ;;  %v536_v5 = vld [vmem:[%s893_s28 + $0x50] sm:$0xff] }
  0xd9   : > { %593 = vst.msk [vmem:[%s904_s5 + $0x10] sm:$0xff] %vm590_vm2, %v560_v1  ;;  %v558_v11 = vadd.f32 %v526_v62, %v494_v2  ;;  %v497_v12 = vmax.f32 %v379_v4, 0.0  ;;  %v371_v14 = vadd.f32 %v887_v50, %v370_v10  ;;  %v434_v15 = vpop.f32.mrf.mxu1  ;;  %v552_v10 = vld [vmem:[%s893_s28 + $0xd0] sm:$0xff] }
  0xda   : > { %609 = vst.msk [vmem:[%s904_s5 + $0x90] sm:$0xff] %vm590_vm2, %v576_v6  ;;  %v574_v16 = vadd.f32 %v542_v3, %v510_v7  ;;  %v513_v17 = vmax.f32 %v443_v9, 0.0  ;;  %v435_v19 = vadd.f32 %v887_v50, %v434_v15  ;;  %v746_v20 = vpop.f32.mrf.mxu0  ;;  %v534_v15 = vld [vmem:[%s893_s28 + $0x40] sm:$0xff] }
  0xdb   : > { %591 = vst.msk [vmem:[%s904_s5] sm:$0xff] %vm590_vm2, %v558_v11  ;;  %v561_v21 = vadd.f32 %v529_v8, %v497_v12  ;;  %v495_v22 = vmax.f32 %v371_v14, 0.0  ;;  %v392_v24 = vadd.f32 %v746_v20, %v887_v50  ;;  %v762_v25 = vpop.f32.mrf.mxu1  ;;  %v550_v20 = vld [vmem:[%s893_s28 + $0xc0] sm:$0xff] }
  0xdc   : > { %607 = vst.msk [vmem:[%s904_s5 + $0x80] sm:$0xff] %vm590_vm2, %v574_v16  ;;  %v577_v26 = vadd.f32 %v545_v13, %v513_v17  ;;  %v511_v27 = vmax.f32 %v435_v19, 0.0  ;;  %v456_v29 = vadd.f32 %v762_v25, %v887_v50  ;;  %v383_v30 = vpop.f32.mrf.mxu0  ;;  %v537_v25 = vld [vmem:[%s893_s28 + $0x58] sm:$0xff] }
  0xdd   : > { %594 = vst.msk [vmem:[%s904_s5 + $0x18] sm:$0xff] %vm590_vm2, %v561_v21  ;;  %v559_v31 = vadd.f32 %v527_v18, %v495_v22  ;;  %v500_v32 = vmax.f32 %v392_v24, 0.0  ;;  %v384_v34 = vadd.f32 %v887_v50, %v383_v30  ;;  %v447_v35 = vpop.f32.mrf.mxu1  ;;  %v553_v30 = vld [vmem:[%s893_s28 + $0xd8] sm:$0xff] }
  0xde   : > { %610 = vst.msk [vmem:[%s904_s5 + $0x98] sm:$0xff] %vm590_vm2, %v577_v26  ;;  %v575_v36 = vadd.f32 %v543_v23, %v511_v27  ;;  %v516_v37 = vmax.f32 %v456_v29, 0.0  ;;  %v448_v39 = vadd.f32 %v887_v50, %v447_v35  ;;  %v747_v40 = vpop.f32.mrf.mxu0  ;;  %v535_v35 = vld [vmem:[%s893_s28 + $0x48] sm:$0xff] }
  0xdf   : > { %592 = vst.msk [vmem:[%s904_s5 + $0x8] sm:$0xff] %vm590_vm2, %v559_v31  ;;  %v564_v41 = vadd.f32 %v532_v28, %v500_v32  ;;  %v498_v42 = vmax.f32 %v384_v34, 0.0  ;;  %v395_v44 = vadd.f32 %v747_v40, %v887_v50  ;;  %v763_v45 = vpop.f32.mrf.mxu1  ;;  %v551_v40 = vld [vmem:[%s893_s28 + $0xc8] sm:$0xff] }
  0xe0   : > { %608 = vst.msk [vmem:[%s904_s5 + $0x88] sm:$0xff] %vm590_vm2, %v575_v36  ;;  %v580_v46 = vadd.f32 %v548_v33, %v516_v37  ;;  %v514_v47 = vmax.f32 %v448_v39, 0.0  ;;  %v459_v49 = vadd.f32 %v763_v45, %v887_v50  ;;  %v386_v51 = vpop.f32.mrf.mxu0  ;;  %v540_v45 = vld [vmem:[%s893_s28 + $0x70] sm:$0xff] }
  0xe1   : > { %597 = vst.msk [vmem:[%s904_s5 + $0x30] sm:$0xff] %vm590_vm2, %v564_v41  ;;  %v562_v52 = vadd.f32 %v530_v38, %v498_v42  ;;  %v501_v53 = vmax.f32 %v395_v44, 0.0  ;;  %v387_v55 = vadd.f32 %v887_v50, %v386_v51  ;;  %v450_v56 = vpop.f32.mrf.mxu1  ;;  %v556_v51 = vld [vmem:[%s893_s28 + $0xf0] sm:$0xff] }
  0xe2   : > { %613 = vst.msk [vmem:[%s904_s5 + $0xb0] sm:$0xff] %vm590_vm2, %v580_v46  ;;  %v578_v57 = vadd.f32 %v546_v43, %v514_v47  ;;  %v517_v58 = vmax.f32 %v459_v49, 0.0  ;;  %v451_v60 = vadd.f32 %v887_v50, %v450_v56  ;;  %v750_v61 = vpop.f32.mrf.mxu0  ;;  %v538_v56 = vld [vmem:[%s893_s28 + $0x60] sm:$0xff] }
  0xe3   : > { %595 = vst.msk [vmem:[%s904_s5 + $0x20] sm:$0xff] %vm590_vm2, %v562_v52  ;;  %v565_v62 = vadd.f32 %v533_v48, %v501_v53  ;;  %v499_v63 = vmax.f32 %v387_v55, 0.0  ;;  %v408_v1 = vadd.f32 %v750_v61, %v887_v50  ;;  %v766_v2 = vpop.f32.mrf.mxu1  ;;  %v554_v61 = vld [vmem:[%s893_s28 + $0xe0] sm:$0xff] }
  0xe4   : > { %611 = vst.msk [vmem:[%s904_s5 + $0xa0] sm:$0xff] %vm590_vm2, %v578_v57  ;;  %v581_v3 = vadd.f32 %v549_v54, %v517_v58  ;;  %v515_v4 = vmax.f32 %v451_v60, 0.0  ;;  %v472_v6 = vadd.f32 %v766_v2, %v887_v50  ;;  %v399_v7 = vpop.f32.mrf.mxu0  ;;  %v541_v2 = vld [vmem:[%s893_s28 + $0x78] sm:$0xff] }
  0xe5   : > { %598 = vst.msk [vmem:[%s904_s5 + $0x38] sm:$0xff] %vm590_vm2, %v565_v62  ;;  %v563_v8 = vadd.f32 %v531_v59, %v499_v63  ;;  %v504_v9 = vmax.f32 %v408_v1, 0.0  ;;  %v400_v11 = vadd.f32 %v887_v50, %v399_v7  ;;  %v463_v12 = vpop.f32.mrf.mxu1  ;;  %v557_v7 = vld [vmem:[%s893_s28 + $0xf8] sm:$0xff] }
  0xe6   : > { %614 = vst.msk [vmem:[%s904_s5 + $0xb8] sm:$0xff] %vm590_vm2, %v581_v3  ;;  %v579_v13 = vadd.f32 %v547_v0, %v515_v4  ;;  %v520_v14 = vmax.f32 %v472_v6, 0.0  ;;  %v464_v16 = vadd.f32 %v887_v50, %v463_v12  ;;  %v751_v17 = vpop.f32.mrf.mxu0  ;;  %v539_v12 = vld [vmem:[%s893_s28 + $0x68] sm:$0xff] }
  0xe7   : > { %596 = vst.msk [vmem:[%s904_s5 + $0x28] sm:$0xff] %vm590_vm2, %v563_v8  ;;  %v568_v18 = vadd.f32 %v536_v5, %v504_v9  ;;  %v502_v19 = vmax.f32 %v400_v11, 0.0  ;;  %v411_v21 = vadd.f32 %v751_v17, %v887_v50  ;;  %v767_v22 = vpop.f32.mrf.mxu1 }
  0xe8   : > { %612 = vst.msk [vmem:[%s904_s5 + $0xa8] sm:$0xff] %vm590_vm2, %v579_v13  ;;  %v584_v23 = vadd.f32 %v552_v10, %v520_v14  ;;  %v518_v24 = vmax.f32 %v464_v16, 0.0  ;;  %v475_v26 = vadd.f32 %v767_v22, %v887_v50  ;;  %v402_v27 = vpop.f32.mrf.mxu0  ;;  %v555_v16 = vld [vmem:[%s893_s28 + $0xe8] sm:$0xff] }
  0xe9   : > { %601 = vst.msk [vmem:[%s904_s5 + $0x50] sm:$0xff] %vm590_vm2, %v568_v18  ;;  %v566_v28 = vadd.f32 %v534_v15, %v502_v19  ;;  %v505_v29 = vmax.f32 %v411_v21, 0.0  ;;  %v403_v31 = vadd.f32 %v887_v50, %v402_v27  ;;  %v466_v32 = vpop.f32.mrf.mxu1 }
  0xea   : > { %617 = vst.msk [vmem:[%s904_s5 + $0xd0] sm:$0xff] %vm590_vm2, %v584_v23  ;;  %v582_v33 = vadd.f32 %v550_v20, %v518_v24  ;;  %v521_v34 = vmax.f32 %v475_v26, 0.0  ;;  %v467_v36 = vadd.f32 %v887_v50, %v466_v32  ;;  %v754_v37 = vpop.f32.mrf.mxu0 }
  0xeb   : > { %599 = vst.msk [vmem:[%s904_s5 + $0x40] sm:$0xff] %vm590_vm2, %v566_v28  ;;  %v569_v38 = vadd.f32 %v537_v25, %v505_v29  ;;  %v503_v39 = vmax.f32 %v403_v31, 0.0  ;;  %v424_v41 = vadd.f32 %v754_v37, %v887_v50  ;;  %v770_v42 = vpop.f32.mrf.mxu1 }
  0xec   : > { %615 = vst.msk [vmem:[%s904_s5 + $0xc0] sm:$0xff] %vm590_vm2, %v582_v33  ;;  %v585_v43 = vadd.f32 %v553_v30, %v521_v34  ;;  %v519_v44 = vmax.f32 %v467_v36, 0.0  ;;  %v488_v46 = vadd.f32 %v770_v42, %v887_v50  ;;  %v415_v47 = vpop.f32.mrf.mxu0 }
  0xed   : > { %602 = vst.msk [vmem:[%s904_s5 + $0x58] sm:$0xff] %vm590_vm2, %v569_v38  ;;  %v567_v48 = vadd.f32 %v535_v35, %v503_v39  ;;  %v508_v49 = vmax.f32 %v424_v41, 0.0  ;;  %v416_v52 = vadd.f32 %v887_v50, %v415_v47  ;;  %v479_v53 = vpop.f32.mrf.mxu1 }
  0xee   : > { %618 = vst.msk [vmem:[%s904_s5 + $0xd8] sm:$0xff] %vm590_vm2, %v585_v43  ;;  %v583_v54 = vadd.f32 %v551_v40, %v519_v44  ;;  %v524_v55 = vmax.f32 %v488_v46, 0.0  ;;  %v480_v57 = vadd.f32 %v887_v50, %v479_v53  ;;  %v755_v58 = vpop.f32.mrf.mxu0 }
  0xef   : > { %600 = vst.msk [vmem:[%s904_s5 + $0x48] sm:$0xff] %vm590_vm2, %v567_v48  ;;  %v572_v59 = vadd.f32 %v540_v45, %v508_v49  ;;  %v506_v60 = vmax.f32 %v416_v52, 0.0  ;;  %v427_v62 = vadd.f32 %v755_v58, %v887_v50  ;;  %v771_v63 = vpop.f32.mrf.mxu1 }
  0xf0   : > { %616 = vst.msk [vmem:[%s904_s5 + $0xc8] sm:$0xff] %vm590_vm2, %v583_v54  ;;  %v588_v0 = vadd.f32 %v556_v51, %v524_v55  ;;  %v522_v1 = vmax.f32 %v480_v57, 0.0  ;;  %v491_v3 = vadd.f32 %v771_v63, %v887_v50  ;;  %v418_v4 = vpop.f32.mrf.mxu0 }
  0xf1   : > { %605 = vst.msk [vmem:[%s904_s5 + $0x70] sm:$0xff] %vm590_vm2, %v572_v59  ;;  %v570_v5 = vadd.f32 %v538_v56, %v506_v60  ;;  %v509_v6 = vmax.f32 %v427_v62, 0.0  ;;  %v419_v8 = vadd.f32 %v887_v50, %v418_v4  ;;  %v482_v9 = vpop.f32.mrf.mxu1 }
  0xf2   : > { %621 = vst.msk [vmem:[%s904_s5 + $0xf0] sm:$0xff] %vm590_vm2, %v588_v0  ;;  %v586_v10 = vadd.f32 %v554_v61, %v522_v1  ;;  %v525_v11 = vmax.f32 %v491_v3, 0.0  ;;  %v483_v13 = vadd.f32 %v887_v50, %v482_v9 }
  0xf3   : > { %603 = vst.msk [vmem:[%s904_s5 + $0x60] sm:$0xff] %vm590_vm2, %v570_v5  ;;  %v573_v14 = vadd.f32 %v541_v2, %v509_v6  ;;  %v507_v15 = vmax.f32 %v419_v8, 0.0 }
  0xf4   : > { %619 = vst.msk [vmem:[%s904_s5 + $0xe0] sm:$0xff] %vm590_vm2, %v586_v10  ;;  %v589_v17 = vadd.f32 %v557_v7, %v525_v11  ;;  %v523_v18 = vmax.f32 %v483_v13, 0.0 }
  0xf5   : > { %606 = vst.msk [vmem:[%s904_s5 + $0x78] sm:$0xff] %vm590_vm2, %v573_v14  ;;  %v571_v19 = vadd.f32 %v539_v12, %v507_v15 }
  0xf6   : > { %622 = vst.msk [vmem:[%s904_s5 + $0xf8] sm:$0xff] %vm590_vm2, %v589_v17  ;;  %v587_v20 = vadd.f32 %v555_v16, %v523_v18 }
  0xf7   : > { %604 = vst.msk [vmem:[%s904_s5 + $0x68] sm:$0xff] %vm590_vm2, %v571_v19 }
  0xf8   : > { %620 = vst.msk [vmem:[%s904_s5 + $0xe8] sm:$0xff] %vm590_vm2, %v587_v20 }
  0xf9 PF: > { %s14_s15 = sadd.s32 1, %s790_s15  }
  0xfa   : > { %p11_p4 = scmp.ge.s32.totalorder %s14_s15, 4  }
  0xfc   :  { %13 = sbr.rel (!%p11_p4) target bundleno = 1 (0x1), region = 69 }

// kernel: axial_block_forward.7
= control target key start
LH: loop header
LB: loop body
LE: loop exit
PB: predicated region body
PF: predicated region fallthrough
CT: control target
= control target key end

     0   :  { %s849_s15 = smov 0   ;;  %s1064_s0 = inlined_call_operand.vmem [shape: f32[512,4], index: 0, kind: input, shape index: {}]   ;;  %s1065_s1 = inlined_call_operand.vmem [shape: f32[512,8], index: 1, kind: input, shape index: {}]   ;;  %s1066_s2 = inlined_call_operand.vmem [shape: bf16[4,8], index: 2, kind: input, shape index: {}]   ;;  %s1067_s3 = inlined_call_operand.vmem [shape: f32[1,8], index: 3, kind: input, shape index: {}]   ;;  %s1068_s4 = inlined_call_operand.vmem [shape: f32[512,8], index: 4, kind: output, shape index: {}]  }
   0x1 LB: > { %s723_s16 = sadd.s32 4294967295, %s822_s15   ;;  %p727_p0 = scmp.ge.s32.totalorder %s822_s15, 1  ;;  %s822_s15 = sphi %s849_s15, %s14_s15  }
   0x2   : > { %p174_p1 = scmp.lt.s32.totalorder %s822_s15, 3 }
   0x4   : > { %p175_p2 = pnand %p727_p0, %p174_p1 }
   0x5   : > { %s728_s19 = sshll.u32 (!%p175_p2), %s723_s16, 5 }
   0x6   : > { %178 = sbr.rel (%p175_p2) target bundleno = 251 (0xfb), region = 36  ;;  %p206_p3 = scmp.lt.s32.totalorder (!%p175_p2), %s728_s19, 63 }
   0xb   : > { %v304_v0 = vld [vmem:[%s1066_s2] sm:$0x3]  ;;  %vm361_vm0 = vcmask 1041408   ;;  %s1070_s19 = smov (!%p206_p3, %s728_s19), 63  ;;  %vm312_vm1 = vcmask 31744   ;;  %vm622_vm2 = vcmask 64512  }
   0xc   : > { %806 = vmatprep.subr.msk.bf16.mxu0 %vm361_vm0, %v304_v0  ;;  %807 = vmatprep.subr.msk.bf16.mxu1 %vm361_vm0, %v304_v0  ;;  %v363_v1 = vsel %vm361_vm0, %v304_v0, 0  ;;  %s860_s20 = sshll.u32 %s1070_s19, 3 }
   0xd   : > { %771 = vmatpush3.bf16.msra.mxu0 %v363_v1  ;;  %805 = vmatpush3.bf16.msra.mxu1 %v363_v1  ;;  %s866_s23 = scalar_lea.vmem %s1064_s0, %s860_s20  ;;  %s920_s26 = scalar_lea.vmem %s1065_s1, %s860_s20 }
   0xe   : > { %v224_v2 = vld [vmem:[%s866_s23] sm:$0xff]  ;;  %v225_v3 = vld [vmem:[%s866_s23 + $0x8] sm:$0xff]  ;;  %v226_v9 = vld [vmem:[%s866_s23 + $0x10] sm:$0xff]  ;;  %s938_s5 = scalar_lea.vmem %s1068_s4, %s860_s20 }
   0xf   : > { %v240_v4 = vld [vmem:[%s866_s23 + $0x80] sm:$0xff]  ;;  %v256_v5 = vmax.f32 %v224_v2, 0.0  ;;  %v257_v6 = vmax.f32 %v225_v3, 0.0  ;;  %v241_v7 = vld [vmem:[%s866_s23 + $0x88] sm:$0xff]  ;;  %v227_v10 = vld [vmem:[%s866_s23 + $0x18] sm:$0xff]  ;;  %v258_v12 = vmax.f32 %v226_v9, 0.0 }
  0x10   : > { %v272_v8 = vmax.f32 %v240_v4, 0.0  ;;  %v273_v11 = vmax.f32 %v241_v7, 0.0  ;;  %v259_v13 = vmax.f32 %v227_v10, 0.0  ;;  %v242_v14 = vld [vmem:[%s866_s23 + $0x90] sm:$0xff]  ;;  %v243_v15 = vld [vmem:[%s866_s23 + $0x98] sm:$0xff]  ;;  %v228_v16 = vld [vmem:[%s866_s23 + $0x20] sm:$0xff] }
  0x11   : > { %v288_v17 = vpack.c.bf16 %v257_v6, %v256_v5  ;;  %v274_v18 = vmax.f32 %v242_v14, 0.0  ;;  %v275_v19 = vmax.f32 %v243_v15, 0.0  ;;  %v229_v20 = vld [vmem:[%s866_s23 + $0x28] sm:$0xff]  ;;  %v260_v21 = vmax.f32 %v228_v16, 0.0  ;;  %v244_v22 = vld [vmem:[%s866_s23 + $0xa0] sm:$0xff]  ;;  %v230_v28 = vld [vmem:[%s866_s23 + $0x30] sm:$0xff] }
  0x12   : > { %v245_v23 = vld [vmem:[%s866_s23 + $0xa8] sm:$0xff]  ;;  %v296_v24 = vpack.c.bf16 %v273_v11, %v272_v8  ;;  %v289_v25 = vpack.c.bf16 %v259_v13, %v258_v12  ;;  %v261_v26 = vmax.f32 %v229_v20, 0.0  ;;  %v276_v27 = vmax.f32 %v244_v22, 0.0  ;;  %v231_v29 = vld [vmem:[%s866_s23 + $0x38] sm:$0xff]  ;;  %v246_v30 = vld [vmem:[%s866_s23 + $0xb0] sm:$0xff] }
  0x13   : > { %772 = vmatprep.mubr.msk.bf16.mxu0 %vm312_vm1, %v288_v17  ;;  %v297_v31 = vpack.c.bf16 %v275_v19, %v274_v18  ;;  %v277_v32 = vmax.f32 %v245_v23, 0.0  ;;  %v247_v33 = vld [vmem:[%s866_s23 + $0xb8] sm:$0xff]  ;;  %v232_v34 = vld [vmem:[%s866_s23 + $0x40] sm:$0xff]  ;;  %v233_v35 = vld [vmem:[%s866_s23 + $0x48] sm:$0xff]  ;;  %v262_v37 = vmax.f32 %v230_v28, 0.0  ;;  %v263_v38 = vmax.f32 %v231_v29, 0.0 }
  0x14   : > { %788 = vmatprep.mubr.msk.bf16.mxu1 %vm312_vm1, %v296_v24  ;;  %773 = vmatmul.mubr.msk.bf16.vlgmr.msra.gmra.mxu0 %vm312_vm1, %v289_v25  ;;  %v290_v36 = vpack.c.bf16 %v261_v26, %v260_v21  ;;  %v278_v39 = vmax.f32 %v246_v30, 0.0  ;;  %v248_v40 = vld [vmem:[%s866_s23 + $0xc0] sm:$0xff]  ;;  %v249_v41 = vld [vmem:[%s866_s23 + $0xc8] sm:$0xff]  ;;  %v279_v43 = vmax.f32 %v247_v33, 0.0  ;;  %v264_v44 = vmax.f32 %v232_v34, 0.0  ;;  %v234_v51 = vld [vmem:[%s866_s23 + $0x50] sm:$0xff] }
  0x15   : > { %789 = vmatmul.mubr.msk.bf16.vlgmr.msra.gmra.mxu1 %vm312_vm1, %v297_v31  ;;  %v298_v42 = vpack.c.bf16 %v277_v32, %v276_v27  ;;  %v265_v45 = vmax.f32 %v233_v35, 0.0  ;;  %v280_v46 = vmax.f32 %v248_v40, 0.0  ;;  %v281_v47 = vmax.f32 %v249_v41, 0.0  ;;  %v235_v52 = vld [vmem:[%s866_s23 + $0x58] sm:$0xff]  ;;  %v250_v53 = vld [vmem:[%s866_s23 + $0xd0] sm:$0xff]  ;;  %v236_v56 = vld [vmem:[%s866_s23 + $0x60] sm:$0xff] }
  0x16   : > { %776 = vmatprep.mubr.msk.bf16.mxu0 %vm312_vm1, %v290_v36  ;;  %v291_v48 = vpack.c.bf16 %v263_v38, %v262_v37  ;;  %v299_v49 = vpack.c.bf16 %v279_v43, %v278_v39  ;;  %v251_v55 = vld [vmem:[%s866_s23 + $0xd8] sm:$0xff]  ;;  %v237_v57 = vld [vmem:[%s866_s23 + $0x68] sm:$0xff]  ;;  %v252_v58 = vld [vmem:[%s866_s23 + $0xe0] sm:$0xff]  ;;  %v266_v60 = vmax.f32 %v234_v51, 0.0  ;;  %v267_v61 = vmax.f32 %v235_v52, 0.0 }
  0x17   : > { %792 = vmatprep.mubr.msk.bf16.mxu1 %vm312_vm1, %v298_v42  ;;  %v292_v50 = vpack.c.bf16 %v265_v45, %v264_v44  ;;  %v300_v54 = vpack.c.bf16 %v281_v47, %v280_v46  ;;  %v253_v59 = vld [vmem:[%s866_s23 + $0xe8] sm:$0xff]  ;;  %v282_v62 = vmax.f32 %v250_v53, 0.0  ;;  %v283_v63 = vmax.f32 %v251_v55, 0.0  ;;  %v238_v7 = vld [vmem:[%s866_s23 + $0x70] sm:$0xff]  ;;  %v239_v8 = vld [vmem:[%s866_s23 + $0x78] sm:$0xff] }
  0x18   : > { %v268_v0 = vmax.f32 %v236_v56, 0.0  ;;  %v269_v1 = vmax.f32 %v237_v57, 0.0  ;;  %v284_v2 = vmax.f32 %v252_v58, 0.0  ;;  %v285_v3 = vmax.f32 %v253_v59, 0.0  ;;  %v254_v10 = vld [vmem:[%s866_s23 + $0xf0] sm:$0xff]  ;;  %v255_v11 = vld [vmem:[%s866_s23 + $0xf8] sm:$0xff] }
  0x19   : > { %v293_v4 = vpack.c.bf16 %v267_v61, %v266_v60  ;;  %v301_v5 = vpack.c.bf16 %v283_v63, %v282_v62  ;;  %v270_v12 = vmax.f32 %v238_v7, 0.0  ;;  %v271_v13 = vmax.f32 %v239_v8, 0.0  ;;  %v925_v18 = vld [vmem:[%s1067_s3] ss:$0 sm:$0xff]  ;;  %v528_v20 = vld [vmem:[%s920_s26 + $0x10] sm:$0xff]  ;;  %v529_v34 = vld [vmem:[%s920_s26 + $0x18] sm:$0xff] }
  0x1a   : > { %v294_v6 = vpack.c.bf16 %v269_v1, %v268_v0  ;;  %v302_v9 = vpack.c.bf16 %v285_v3, %v284_v2  ;;  %v286_v14 = vmax.f32 %v254_v10, 0.0  ;;  %v287_v15 = vmax.f32 %v255_v11, 0.0  ;;  %v544_v23 = vld [vmem:[%s920_s26 + $0x90] sm:$0xff]  ;;  %v526_v26 = vld [vmem:[%s920_s26] sm:$0xff]  ;;  %v545_v39 = vld [vmem:[%s920_s26 + $0x98] sm:$0xff] }
  0x1b   : > { %v295_v16 = vpack.c.bf16 %v271_v13, %v270_v12  ;;  %v542_v30 = vld [vmem:[%s920_s26 + $0x80] sm:$0xff]  ;;  %v527_v44 = vld [vmem:[%s920_s26 + $0x8] sm:$0xff]  ;;  %v548_v59 = vld [vmem:[%s920_s26 + $0xb0] sm:$0xff] }
  0x1c   : > { %777 = vmatmul.mubr.msk.bf16.gmra.mxu0 %vm312_vm1, %v291_v48  ;;  %v303_v17 = vpack.c.bf16 %v287_v15, %v286_v14  ;;  %v530_v0 = vld [vmem:[%s920_s26 + $0x20] sm:$0xff]  ;;  %v533_v10 = vld [vmem:[%s920_s26 + $0x38] sm:$0xff] }
  0x1d   : > { %793 = vmatmul.mubr.msk.bf16.gmra.mxu1 %vm312_vm1, %v299_v49  ;;  %780 = vmatprep.mubr.msk.bf16.mxu0 %vm312_vm1, %v292_v50  ;;  %v543_v49 = vld [vmem:[%s920_s26 + $0x88] sm:$0xff]  ;;  %v549_v15 = vld [vmem:[%s920_s26 + $0xb8] sm:$0xff] }
  0x1e   : > { %796 = vmatprep.mubr.msk.bf16.mxu1 %vm312_vm1, %v300_v54  ;;  %v532_v54 = vld [vmem:[%s920_s26 + $0x30] sm:$0xff] }
  0x24   : > { %781 = vmatmul.mubr.msk.bf16.gmra.mxu0 %vm312_vm1, %v293_v4 }
  0x25   : > { %797 = vmatmul.mubr.msk.bf16.gmra.mxu1 %vm312_vm1, %v301_v5  ;;  %784 = vmatprep.mubr.msk.bf16.mxu0 %vm312_vm1, %v294_v6  ;;  %v546_v5 = vld [vmem:[%s920_s26 + $0xa0] sm:$0xff] }
  0x26   : > { %800 = vmatprep.mubr.msk.bf16.mxu1 %vm312_vm1, %v302_v9 }
  0x2c   : > { %785 = vmatmul.mubr.msk.bf16.gmra.mxu0 %vm312_vm1, %v295_v16 }
  0x2d   : > { %801 = vmatmul.mubr.msk.bf16.gmra.mxu1 %vm312_vm1, %v303_v17 }
  0xd4   : > { %v774_v19 = vpop.f32.mrf.mxu0 }
  0xd5   : > { %v408_v21 = vadd.f32 %v774_v19, %v925_v18  ;;  %v790_v22 = vpop.f32.mrf.mxu1 }
  0xd6   : > { %v472_v24 = vadd.f32 %v790_v22, %v925_v18  ;;  %v399_v25 = vpop.f32.mrf.mxu0 }
  0xd7   : > { %v560_v27 = vadd.f32 %v528_v20, %v408_v21  ;;  %v400_v28 = vadd.f32 %v925_v18, %v399_v25  ;;  %v463_v29 = vpop.f32.mrf.mxu1  ;;  %v531_v21 = vld [vmem:[%s920_s26 + $0x28] sm:$0xff] }
  0xd8   : > { %v576_v31 = vadd.f32 %v544_v23, %v472_v24  ;;  %v464_v32 = vadd.f32 %v925_v18, %v463_v29  ;;  %v775_v33 = vpop.f32.mrf.mxu0 }
  0xd9   : > { %v592_v35 = vmax.f32 %v560_v27, 0.0  ;;  %v558_v36 = vadd.f32 %v526_v26, %v400_v28  ;;  %v411_v37 = vadd.f32 %v775_v33, %v925_v18  ;;  %v791_v38 = vpop.f32.mrf.mxu1  ;;  %v547_v26 = vld [vmem:[%s920_s26 + $0xa8] sm:$0xff] }
  0xda   : > { %v608_v40 = vmax.f32 %v576_v31, 0.0  ;;  %v574_v41 = vadd.f32 %v542_v30, %v464_v32  ;;  %v475_v42 = vadd.f32 %v791_v38, %v925_v18  ;;  %v402_v43 = vpop.f32.mrf.mxu0  ;;  %v536_v31 = vld [vmem:[%s920_s26 + $0x50] sm:$0xff] }
  0xdb   : > { %625 = vst.msk [vmem:[%s938_s5 + $0x10] sm:$0xff] %vm622_vm2, %v592_v35  ;;  %v590_v45 = vmax.f32 %v558_v36, 0.0  ;;  %v561_v46 = vadd.f32 %v529_v34, %v411_v37  ;;  %v403_v47 = vadd.f32 %v925_v18, %v402_v43  ;;  %v466_v48 = vpop.f32.mrf.mxu1  ;;  %v552_v36 = vld [vmem:[%s920_s26 + $0xd0] sm:$0xff] }
  0xdc   : > { %641 = vst.msk [vmem:[%s938_s5 + $0x90] sm:$0xff] %vm622_vm2, %v608_v40  ;;  %v606_v50 = vmax.f32 %v574_v41, 0.0  ;;  %v577_v51 = vadd.f32 %v545_v39, %v475_v42  ;;  %v467_v52 = vadd.f32 %v925_v18, %v466_v48  ;;  %v778_v53 = vpop.f32.mrf.mxu0  ;;  %v534_v41 = vld [vmem:[%s920_s26 + $0x40] sm:$0xff] }
  0xdd   : > { %623 = vst.msk [vmem:[%s938_s5] sm:$0xff] %vm622_vm2, %v590_v45  ;;  %v593_v55 = vmax.f32 %v561_v46, 0.0  ;;  %v559_v56 = vadd.f32 %v527_v44, %v403_v47  ;;  %v424_v57 = vadd.f32 %v778_v53, %v925_v18  ;;  %v794_v58 = vpop.f32.mrf.mxu1  ;;  %v550_v46 = vld [vmem:[%s920_s26 + $0xc0] sm:$0xff] }
  0xde   : > { %639 = vst.msk [vmem:[%s938_s5 + $0x80] sm:$0xff] %vm622_vm2, %v606_v50  ;;  %v609_v60 = vmax.f32 %v577_v51, 0.0  ;;  %v575_v61 = vadd.f32 %v543_v49, %v467_v52  ;;  %v488_v62 = vadd.f32 %v794_v58, %v925_v18  ;;  %v415_v63 = vpop.f32.mrf.mxu0  ;;  %v537_v51 = vld [vmem:[%s920_s26 + $0x58] sm:$0xff] }
  0xdf   : > { %626 = vst.msk [vmem:[%s938_s5 + $0x18] sm:$0xff] %vm622_vm2, %v593_v55  ;;  %v591_v1 = vmax.f32 %v559_v56, 0.0  ;;  %v564_v2 = vadd.f32 %v532_v54, %v424_v57  ;;  %v416_v3 = vadd.f32 %v925_v18, %v415_v63  ;;  %v479_v4 = vpop.f32.mrf.mxu1  ;;  %v553_v56 = vld [vmem:[%s920_s26 + $0xd8] sm:$0xff] }
  0xe0   : > { %642 = vst.msk [vmem:[%s938_s5 + $0x98] sm:$0xff] %vm622_vm2, %v609_v60  ;;  %v607_v6 = vmax.f32 %v575_v61, 0.0  ;;  %v580_v7 = vadd.f32 %v548_v59, %v488_v62  ;;  %v480_v8 = vadd.f32 %v925_v18, %v479_v4  ;;  %v779_v9 = vpop.f32.mrf.mxu0  ;;  %v535_v61 = vld [vmem:[%s920_s26 + $0x48] sm:$0xff] }
  0xe1   : > { %624 = vst.msk [vmem:[%s938_s5 + $0x8] sm:$0xff] %vm622_vm2, %v591_v1  ;;  %v596_v11 = vmax.f32 %v564_v2, 0.0  ;;  %v562_v12 = vadd.f32 %v530_v0, %v416_v3  ;;  %v427_v13 = vadd.f32 %v779_v9, %v925_v18  ;;  %v795_v14 = vpop.f32.mrf.mxu1  ;;  %v551_v2 = vld [vmem:[%s920_s26 + $0xc8] sm:$0xff] }
  0xe2   : > { %640 = vst.msk [vmem:[%s938_s5 + $0x88] sm:$0xff] %vm622_vm2, %v607_v6  ;;  %v612_v16 = vmax.f32 %v580_v7, 0.0  ;;  %v578_v17 = vadd.f32 %v546_v5, %v480_v8  ;;  %v491_v19 = vadd.f32 %v795_v14, %v925_v18  ;;  %v418_v20 = vpop.f32.mrf.mxu0  ;;  %v540_v7 = vld [vmem:[%s920_s26 + $0x70] sm:$0xff] }
  0xe3   : > { %629 = vst.msk [vmem:[%s938_s5 + $0x30] sm:$0xff] %vm622_vm2, %v596_v11  ;;  %v594_v22 = vmax.f32 %v562_v12, 0.0  ;;  %v565_v23 = vadd.f32 %v533_v10, %v427_v13  ;;  %v419_v24 = vadd.f32 %v925_v18, %v418_v20  ;;  %v482_v25 = vpop.f32.mrf.mxu1  ;;  %v556_v12 = vld [vmem:[%s920_s26 + $0xf0] sm:$0xff] }
  0xe4   : > { %645 = vst.msk [vmem:[%s938_s5 + $0xb0] sm:$0xff] %vm622_vm2, %v612_v16  ;;  %v610_v27 = vmax.f32 %v578_v17, 0.0  ;;  %v581_v28 = vadd.f32 %v549_v15, %v491_v19  ;;  %v483_v29 = vadd.f32 %v925_v18, %v482_v25  ;;  %v782_v30 = vpop.f32.mrf.mxu0  ;;  %v538_v17 = vld [vmem:[%s920_s26 + $0x60] sm:$0xff] }
  0xe5   : > { %627 = vst.msk [vmem:[%s938_s5 + $0x20] sm:$0xff] %vm622_vm2, %v594_v22  ;;  %v597_v32 = vmax.f32 %v565_v23, 0.0  ;;  %v563_v33 = vadd.f32 %v531_v21, %v419_v24  ;;  %v440_v34 = vadd.f32 %v782_v30, %v925_v18  ;;  %v798_v35 = vpop.f32.mrf.mxu1  ;;  %v554_v23 = vld [vmem:[%s920_s26 + $0xe0] sm:$0xff] }
  0xe6   : > { %643 = vst.msk [vmem:[%s938_s5 + $0xa0] sm:$0xff] %vm622_vm2, %v610_v27  ;;  %v613_v37 = vmax.f32 %v581_v28, 0.0  ;;  %v579_v38 = vadd.f32 %v547_v26, %v483_v29  ;;  %v504_v39 = vadd.f32 %v798_v35, %v925_v18  ;;  %v431_v40 = vpop.f32.mrf.mxu0  ;;  %v541_v28 = vld [vmem:[%s920_s26 + $0x78] sm:$0xff] }
  0xe7   : > { %630 = vst.msk [vmem:[%s938_s5 + $0x38] sm:$0xff] %vm622_vm2, %v597_v32  ;;  %v595_v42 = vmax.f32 %v563_v33, 0.0  ;;  %v568_v43 = vadd.f32 %v536_v31, %v440_v34  ;;  %v432_v44 = vadd.f32 %v925_v18, %v431_v40  ;;  %v495_v45 = vpop.f32.mrf.mxu1  ;;  %v557_v33 = vld [vmem:[%s920_s26 + $0xf8] sm:$0xff] }
  0xe8   : > { %646 = vst.msk [vmem:[%s938_s5 + $0xb8] sm:$0xff] %vm622_vm2, %v613_v37  ;;  %v611_v47 = vmax.f32 %v579_v38, 0.0  ;;  %v584_v48 = vadd.f32 %v552_v36, %v504_v39  ;;  %v496_v49 = vadd.f32 %v925_v18, %v495_v45  ;;  %v783_v50 = vpop.f32.mrf.mxu0  ;;  %v539_v38 = vld [vmem:[%s920_s26 + $0x68] sm:$0xff] }
  0xe9   : > { %628 = vst.msk [vmem:[%s938_s5 + $0x28] sm:$0xff] %vm622_vm2, %v595_v42  ;;  %v600_v52 = vmax.f32 %v568_v43, 0.0  ;;  %v566_v53 = vadd.f32 %v534_v41, %v432_v44  ;;  %v443_v54 = vadd.f32 %v783_v50, %v925_v18  ;;  %v799_v55 = vpop.f32.mrf.mxu1  ;;  %v555_v43 = vld [vmem:[%s920_s26 + $0xe8] sm:$0xff] }
  0xea   : > { %644 = vst.msk [vmem:[%s938_s5 + $0xa8] sm:$0xff] %vm622_vm2, %v611_v47  ;;  %v616_v57 = vmax.f32 %v584_v48, 0.0  ;;  %v582_v58 = vadd.f32 %v550_v46, %v496_v49  ;;  %v507_v59 = vadd.f32 %v799_v55, %v925_v18  ;;  %v434_v60 = vpop.f32.mrf.mxu0 }
  0xeb   : > { %633 = vst.msk [vmem:[%s938_s5 + $0x50] sm:$0xff] %vm622_vm2, %v600_v52  ;;  %v598_v62 = vmax.f32 %v566_v53, 0.0  ;;  %v569_v63 = vadd.f32 %v537_v51, %v443_v54  ;;  %v435_v0 = vadd.f32 %v925_v18, %v434_v60  ;;  %v498_v1 = vpop.f32.mrf.mxu1 }
  0xec   : > { %649 = vst.msk [vmem:[%s938_s5 + $0xd0] sm:$0xff] %vm622_vm2, %v616_v57  ;;  %v614_v3 = vmax.f32 %v582_v58, 0.0  ;;  %v585_v4 = vadd.f32 %v553_v56, %v507_v59  ;;  %v499_v5 = vadd.f32 %v925_v18, %v498_v1  ;;  %v786_v6 = vpop.f32.mrf.mxu0 }
  0xed   : > { %631 = vst.msk [vmem:[%s938_s5 + $0x40] sm:$0xff] %vm622_vm2, %v598_v62  ;;  %v601_v8 = vmax.f32 %v569_v63, 0.0  ;;  %v567_v9 = vadd.f32 %v535_v61, %v435_v0  ;;  %v456_v10 = vadd.f32 %v786_v6, %v925_v18  ;;  %v802_v11 = vpop.f32.mrf.mxu1 }
  0xee   : > { %647 = vst.msk [vmem:[%s938_s5 + $0xc0] sm:$0xff] %vm622_vm2, %v614_v3  ;;  %v617_v13 = vmax.f32 %v585_v4, 0.0  ;;  %v583_v14 = vadd.f32 %v551_v2, %v499_v5  ;;  %v520_v15 = vadd.f32 %v802_v11, %v925_v18  ;;  %v447_v16 = vpop.f32.mrf.mxu0 }
  0xef   : > { %634 = vst.msk [vmem:[%s938_s5 + $0x58] sm:$0xff] %vm622_vm2, %v601_v8  ;;  %v599_v19 = vmax.f32 %v567_v9, 0.0  ;;  %v572_v20 = vadd.f32 %v540_v7, %v456_v10  ;;  %v448_v21 = vadd.f32 %v925_v18, %v447_v16  ;;  %v511_v22 = vpop.f32.mrf.mxu1 }
  0xf0   : > { %650 = vst.msk [vmem:[%s938_s5 + $0xd8] sm:$0xff] %vm622_vm2, %v617_v13  ;;  %v615_v24 = vmax.f32 %v583_v14, 0.0  ;;  %v588_v25 = vadd.f32 %v556_v12, %v520_v15  ;;  %v512_v26 = vadd.f32 %v925_v18, %v511_v22  ;;  %v787_v27 = vpop.f32.mrf.mxu0 }
  0xf1   : > { %632 = vst.msk [vmem:[%s938_s5 + $0x48] sm:$0xff] %vm622_vm2, %v599_v19  ;;  %v604_v29 = vmax.f32 %v572_v20, 0.0  ;;  %v570_v30 = vadd.f32 %v538_v17, %v448_v21  ;;  %v459_v31 = vadd.f32 %v787_v27, %v925_v18  ;;  %v803_v32 = vpop.f32.mrf.mxu1 }
  0xf2   : > { %648 = vst.msk [vmem:[%s938_s5 + $0xc8] sm:$0xff] %vm622_vm2, %v615_v24  ;;  %v620_v34 = vmax.f32 %v588_v25, 0.0  ;;  %v586_v35 = vadd.f32 %v554_v23, %v512_v26  ;;  %v523_v36 = vadd.f32 %v803_v32, %v925_v18  ;;  %v450_v37 = vpop.f32.mrf.mxu0 }
  0xf3   : > { %637 = vst.msk [vmem:[%s938_s5 + $0x70] sm:$0xff] %vm622_vm2, %v604_v29  ;;  %v602_v39 = vmax.f32 %v570_v30, 0.0  ;;  %v573_v40 = vadd.f32 %v541_v28, %v459_v31  ;;  %v451_v41 = vadd.f32 %v925_v18, %v450_v37  ;;  %v514_v42 = vpop.f32.mrf.mxu1 }
  0xf4   : > { %653 = vst.msk [vmem:[%s938_s5 + $0xf0] sm:$0xff] %vm622_vm2, %v620_v34  ;;  %v618_v44 = vmax.f32 %v586_v35, 0.0  ;;  %v589_v45 = vadd.f32 %v557_v33, %v523_v36  ;;  %v515_v46 = vadd.f32 %v925_v18, %v514_v42 }
  0xf5   : > { %635 = vst.msk [vmem:[%s938_s5 + $0x60] sm:$0xff] %vm622_vm2, %v602_v39  ;;  %v605_v47 = vmax.f32 %v573_v40, 0.0  ;;  %v571_v48 = vadd.f32 %v539_v38, %v451_v41 }
  0xf6   : > { %651 = vst.msk [vmem:[%s938_s5 + $0xe0] sm:$0xff] %vm622_vm2, %v618_v44  ;;  %v621_v49 = vmax.f32 %v589_v45, 0.0  ;;  %v587_v50 = vadd.f32 %v555_v43, %v515_v46 }
  0xf7   : > { %638 = vst.msk [vmem:[%s938_s5 + $0x78] sm:$0xff] %vm622_vm2, %v605_v47  ;;  %v603_v51 = vmax.f32 %v571_v48, 0.0 }
  0xf8   : > { %654 = vst.msk [vmem:[%s938_s5 + $0xf8] sm:$0xff] %vm622_vm2, %v621_v49  ;;  %v619_v52 = vmax.f32 %v587_v50, 0.0 }
  0xf9   : > { %636 = vst.msk [vmem:[%s938_s5 + $0x68] sm:$0xff] %vm622_vm2, %v603_v51 }
  0xfa   : > { %652 = vst.msk [vmem:[%s938_s5 + $0xe8] sm:$0xff] %vm622_vm2, %v619_v52 }
  0xfb PF: > { %s14_s15 = sadd.s32 1, %s822_s15  }
  0xfc   : > { %p11_p4 = scmp.ge.s32.totalorder %s14_s15, 4  }
  0xfe   :  { %13 = sbr.rel (!%p11_p4) target bundleno = 1 (0x1), region = 69 }

// kernel: axial_block_forward.5
= control target key start
LH: loop header
LB: loop body
LE: loop exit
PB: predicated region body
PF: predicated region fallthrough
CT: control target
= control target key end

     0   :  { %s5290_s18 = smov 0   ;;  %s6171_s0 = inlined_call_operand.vmem [shape: f32[32,16,4], index: 0, kind: input, shape index: {}]   ;;  %s6172_s1 = inlined_call_operand.vmem [shape: bf16[4,4], index: 1, kind: input, shape index: {}]   ;;  %s6173_s2 = inlined_call_operand.vmem [shape: bf16[4,8], index: 2, kind: input, shape index: {}]   ;;  %s6174_s3 = inlined_call_operand.vmem [shape: bf16[4,4], index: 3, kind: input, shape index: {}]   ;;  %s6175_s4 = inlined_call_operand.vmem [shape: f32[1,4], index: 4, kind: input, shape index: {}]   ;;  %s6176_s5 = inlined_call_operand.vmem [shape: f32[32,16,4], index: 5, kind: output, shape index: {}]  }
   0x1 LB: > { %s4356_s19 = sadd.s32 4294967295, %s5254_s18   ;;  %p4360_p0 = scmp.ge.s32.totalorder %s5254_s18, 1  ;;  %s5254_s18 = sphi %s5290_s18, %s15_s18  }
   0x2   : > { %p189_p1 = scmp.lt.s32.totalorder %s5254_s18, 5 }
   0x4   : > { %p190_p2 = pnand %p4360_p0, %p189_p1 }
   0x5   : > { %s4361_s24 = sshll.u32 (!%p190_p2), %s4356_s19, 3  ;;  %s5257_s29 = smov (!%p190_p2), 124  }
   0x6   : > { %193 = sbr.rel (%p190_p2) target bundleno = 1963 (0x7ab), region = 40  ;;  %p220_p3 = scmp.lt.s32.totalorder (!%p190_p2), %s4361_s24, 31 }
   0x7   : > { %s5258_s30 = smov (!%p190_p2), 126   ;;  %s5259_s6 = smov (!%p190_p2), 122  }
   0xb   : > { %v259_v0 = vld [vmem:[%s6173_s2] sm:$0x3]  ;;  %vm286_vm0 = vcmask 1041408   ;;  %v491_v2 = vlaneseq  ;;  %v5256_v5 = vmov 1983009808   ;;  %s6181_s24 = smov (!%p220_p3, %s4361_s24), 31 }
   0xc   : > { %v5304_v1 = vld [vmem:[%s6172_s1] sm:$0x3]  ;;  %5101 = vmatprep.subr.msk.bf16.mxu1 %vm286_vm0, %v259_v0  ;;  %v388_v3 = vsel %vm286_vm0, %v259_v0, 0  ;;  %v489_v6 = vunpack.c.l.s4 %v5256_v5  ;;  %s4530_s25 = sshll.u32 %s6181_s24, 4  ;;  %vm261_vm1 = vcmask 31744   ;;  %vm597_vm2 = vcmask 15360  }
   0xd   : > { %5100 = vmatprep.subr.msk.bf16.mxu0 %vm286_vm0, %v5304_v1  ;;  %v288_v4 = vsel %vm286_vm0, %v5304_v1, 0  ;;  %4751 = vmatpush3.bf16.msra.mxu1 %v388_v3  ;;  %v492_v7 = vshrl.u32 %v491_v2, 7  ;;  %s5320_s28 = scalar_lea.vmem %s6171_s0, %s4530_s25  ;;  %vm1310_vm3 = vcmask 130048   ;;  %vm4034_vm4 = vcmask 1040384   ;;  %s6118_s13 = scalar_lea.vmem %s6176_s5, %s4530_s25 }
   0xe   : > { %4733 = vmatpush3.bf16.msra.mxu0 %v288_v4  ;;  %v490_v8 = vunpack.c.0.s8 %v489_v6  ;;  %v234_v10 = vld [vmem:[%s5320_s28] sm:$0xff]  ;;  %v235_v11 = vld [vmem:[%s5320_s28 + $0x8] sm:$0xff]  ;;  %v236_v12 = vld [vmem:[%s5320_s28 + $0x10] sm:$0xff] }
   0xf   : > { %v5327_v13 = vpack.c.bf16 %v235_v11, %v234_v10  ;;  %v237_v14 = vld [vmem:[%s5320_s28 + $0x18] sm:$0xff]  ;;  %v238_v15 = vld [vmem:[%s5320_s28 + $0x20] sm:$0xff]  ;;  %v239_v16 = vld [vmem:[%s5320_s28 + $0x28] sm:$0xff] }
  0x10   : > { %v5322_v9 = vsub.s32 %v490_v8, %v492_v7  ;;  %v5332_v17 = vpack.c.bf16 %v237_v14, %v236_v12  ;;  %v5334_v18 = vpack.c.bf16 %v239_v16, %v238_v15  ;;  %v240_v20 = vld [vmem:[%s5320_s28 + $0x30] sm:$0xff]  ;;  %v241_v21 = vld [vmem:[%s5320_s28 + $0x38] sm:$0xff]  ;;  %v242_v22 = vld [vmem:[%s5320_s28 + $0x40] sm:$0xff] }
  0x11   : > { %4752 = vmatprep.mubr.msk.bf16.mxu1 %vm261_vm1, %v5327_v13  ;;  %4734 = vmatprep.mubr.msk.bf16.mxu0 %vm261_vm1, %v5327_v13  ;;  %v243_v23 = vld [vmem:[%s5320_s28 + $0x48] sm:$0xff]  ;;  %v5356_v24 = vpack.c.bf16 %v241_v21, %v240_v20  ;;  %v244_v26 = vld [vmem:[%s5320_s28 + $0x50] sm:$0xff]  ;;  %v245_v27 = vld [vmem:[%s5320_s28 + $0x58] sm:$0xff] }
  0x12   : > { %v5337_v19 = vrot.slane %v259_v0, %v5322_v9  ;;  %4753 = vmatmul.mubr.msk.bf16.vlgmr.msra.gmra.mxu1 %vm261_vm1, %v5332_v17  ;;  %4735 = vmatmul.mubr.msk.bf16.vlgmr.msra.gmra.mxu0 %vm261_vm1, %v5332_v17  ;;  %v5358_v25 = vpack.c.bf16 %v243_v23, %v242_v22  ;;  %v246_v28 = vld [vmem:[%s5320_s28 + $0x60] sm:$0xff]  ;;  %v247_v29 = vld [vmem:[%s5320_s28 + $0x68] sm:$0xff]  ;;  %v5372_v30 = vpack.c.bf16 %v245_v27, %v244_v26  ;;  %v248_v32 = vld [vmem:[%s5320_s28 + $0x70] sm:$0xff] }
  0x13   : > { %4756 = vmatprep.mubr.msk.bf16.mxu1 %vm261_vm1, %v5334_v18  ;;  %4738 = vmatprep.mubr.msk.bf16.mxu0 %vm261_vm1, %v5334_v18  ;;  %v5374_v31 = vpack.c.bf16 %v247_v29, %v246_v28  ;;  %v249_v33 = vld [vmem:[%s5320_s28 + $0x78] sm:$0xff] }
  0x14   : > { %495 = vrot.lane.b32.xlu0 %v5337_v19, %s5257_s29  ;;  %v5386_v34 = vpack.c.bf16 %v249_v33, %v248_v32 }
  0x1a   : > { %4757 = vmatmul.mubr.msk.bf16.gmra.mxu1 %vm261_vm1, %v5356_v24  ;;  %4739 = vmatmul.mubr.msk.bf16.gmra.mxu0 %vm261_vm1, %v5356_v24 }
  0x1b   : > { %4760 = vmatprep.mubr.msk.bf16.mxu1 %vm261_vm1, %v5358_v25  ;;  %4742 = vmatprep.mubr.msk.bf16.mxu0 %vm261_vm1, %v5358_v25 }
  0x22   : > { %4761 = vmatmul.mubr.msk.bf16.gmra.mxu1 %vm261_vm1, %v5372_v30  ;;  %4743 = vmatmul.mubr.msk.bf16.gmra.mxu0 %vm261_vm1, %v5372_v30 }
  0x23   : > { %4764 = vmatprep.mubr.msk.bf16.mxu1 %vm261_vm1, %v5374_v31  ;;  %4746 = vmatprep.mubr.msk.bf16.mxu0 %vm261_vm1, %v5374_v31 }
  0x2a   : > { %4765 = vmatmul.mubr.msk.bf16.gmra.mxu1 %vm261_vm1, %v5386_v34  ;;  %4747 = vmatmul.mubr.msk.bf16.gmra.mxu0 %vm261_vm1, %v5386_v34 }
  0x2b   : > { %4770 = vmatprep.mubr.msk.bf16.mxu0 %vm261_vm1, %v5327_v13 }
  0x86   : > { %v496_v35 = vpop.permute.xlu0 %495 }
  0x87   : > { %v498_v36 = vsel %vm286_vm0, %v496_v35, 0  ;;  %5102 = vmatprep.subr.msk.bf16.mxu0 %vm286_vm0, %v496_v35 }
  0x88   : > { %4769 = vmatpush3.bf16.msra.mxu0 %v498_v36 }
  0x8b   : > { %4771 = vmatmul.mubr.msk.bf16.vlgmr.msra.gmra.mxu0 %vm261_vm1, %v5332_v17 }
  0x8c   : > { %4774 = vmatprep.mubr.msk.bf16.mxu0 %vm261_vm1, %v5334_v18 }
  0x93   : > { %4775 = vmatmul.mubr.msk.bf16.gmra.mxu0 %vm261_vm1, %v5356_v24 }
  0x94   : > { %4778 = vmatprep.mubr.msk.bf16.mxu0 %vm261_vm1, %v5358_v25 }
  0x9b   : > { %4779 = vmatmul.mubr.msk.bf16.gmra.mxu0 %vm261_vm1, %v5372_v30 }
  0x9c   : > { %4782 = vmatprep.mubr.msk.bf16.mxu0 %vm261_vm1, %v5374_v31 }
  0xa3   : > { %4783 = vmatmul.mubr.msk.bf16.gmra.mxu0 %vm261_vm1, %v5386_v34 }
  0xd2   : > { %v4754_v37 = vpop.f32.mrf.mxu1  ;;  %v4736_v38 = vpop.f32.mrf.mxu0 }
  0xd4   : > { %v424_v39 = vpop.f32.mrf.mxu1  ;;  %v324_v40 = vpop.f32.mrf.mxu0 }
  0xd5   : > { %4790 = vmatprep.mubr.msk.f32.mxu1 %vm597_vm2, %v324_v40 }
  0xd6   : > { %v4755_v41 = vpop.f32.mrf.mxu1  ;;  %v4737_v42 = vpop.f32.mrf.mxu0 }
  0xd8   : > { %v427_v43 = vpop.f32.mrf.mxu1  ;;  %v327_v44 = vpop.f32.mrf.mxu0 }
  0xd9   : > { %4786 = vmatprep.subr.msk.mxu1 %vm597_vm2, %v427_v43 }
  0xda   : > { %4787 = vmatpush3.xpose.msk.msra.mxu1 %vm597_vm2, %v427_v43  ;;  %v4758_v45 = vpop.f32.mrf.mxu1  ;;  %v4740_v46 = vpop.f32.mrf.mxu0 }
  0xdb   : > { %4788 = vmatprep.subr.msk.mxu1 %vm597_vm2, %v424_v39 }
  0xdc   : > { %v440_v47 = vpop.f32.mrf.mxu1  ;;  %v340_v48 = vpop.f32.mrf.mxu0 }
  0xde   : > { %4789 = vmatpush3.xpose.msk.msra.mxu1 %vm597_vm2, %v424_v39  ;;  %v4759_v49 = vpop.f32.mrf.mxu1  ;;  %v4741_v50 = vpop.f32.mrf.mxu0 }
  0xdf   : > { %4793 = vmatprep.subr.msk.mxu1 %vm597_vm2, %v4755_v41 }
  0xe0   : > { %v443_v51 = vpop.f32.mrf.mxu1  ;;  %v343_v52 = vpop.f32.mrf.mxu0 }
  0xe1   : > { %4791 = vmatmul.mubr.msk.f32.vlgmr.msra.gmra.mxu1 %vm597_vm2, %v327_v44 }
  0xe2   : > { %4794 = vmatpush3.xpose.msk.msra.mxu1 %vm597_vm2, %v4755_v41  ;;  %4797 = vmatprep.mubr.msk.f32.mxu1 %vm597_vm2, %v4736_v38  ;;  %v4762_v53 = vpop.f32.mrf.mxu1  ;;  %v4744_v54 = vpop.f32.mrf.mxu0 }
  0xe3   : > { %4795 = vmatprep.subr.msk.mxu1 %vm597_vm2, %v4754_v37 }
  0xe4   : > { %v456_v55 = vpop.f32.mrf.mxu1  ;;  %v356_v56 = vpop.f32.mrf.mxu0 }
  0xe5   : > { %4818 = vmatprep.mubr.msk.f32.mxu0 %vm597_vm2, %v356_v56 }
  0xe6   : > { %4796 = vmatpush3.xpose.msk.msra.mxu1 %vm597_vm2, %v4754_v37  ;;  %v4763_v57 = vpop.f32.mrf.mxu1  ;;  %v4745_v58 = vpop.f32.mrf.mxu0 }
  0xe7   : > { %4800 = vmatprep.subr.msk.mxu1 %vm597_vm2, %v443_v51 }
  0xe8   : > { %v459_v59 = vpop.f32.mrf.mxu1  ;;  %v359_v61 = vpop.f32.mrf.mxu0 }
  0xe9   : > { %4798 = vmatmul.mubr.msk.f32.vlgmr.msra.gmra.mxu1 %vm597_vm2, %v4737_v42  ;;  %4814 = vmatprep.subr.msk.mxu0 %vm597_vm2, %v459_v59 }
  0xea   : > { %4801 = vmatpush3.xpose.msk.msra.mxu1 %vm597_vm2, %v443_v51  ;;  %4804 = vmatprep.mubr.msk.f32.mxu1 %vm597_vm2, %v340_v48  ;;  %v4766_v60 = vpop.f32.mrf.mxu1  ;;  %v4748_v63 = vpop.f32.mrf.mxu0 }
  0xeb   : > { %4802 = vmatprep.subr.msk.mxu1 %vm597_vm2, %v440_v47  ;;  %4815 = vmatpush3.xpose.msk.msra.mxu0 %vm597_vm2, %v459_v59 }
  0xec   : > { %v472_v62 = vpop.f32.mrf.mxu1  ;;  %4816 = vmatprep.subr.msk.mxu0 %vm597_vm2, %v456_v55  ;;  %v372_v3 = vpop.f32.mrf.mxu0 }
  0xee   : > { %4803 = vmatpush3.xpose.msk.msra.mxu1 %vm597_vm2, %v440_v47  ;;  %v4767_v0 = vpop.f32.mrf.mxu1  ;;  %v4749_v4 = vpop.f32.mrf.mxu0 }
  0xef   : > { %4807 = vmatprep.subr.msk.mxu1 %vm597_vm2, %v4759_v49  ;;  %4817 = vmatpush3.xpose.msk.msra.mxu0 %vm597_vm2, %v456_v55 }
  0xf0   : > { %v475_v2 = vpop.f32.mrf.mxu1  ;;  %v375_v5 = vpop.f32.mrf.mxu0 }
  0xf1   : > { %4805 = vmatmul.mubr.msk.f32.vlgmr.msra.gmra.mxu1 %vm597_vm2, %v343_v52  ;;  %4828 = vmatprep.subr.msk.mxu0 %vm597_vm2, %v475_v2 }
  0xf2   : > { %4808 = vmatpush3.xpose.msk.msra.mxu1 %vm597_vm2, %v4759_v49  ;;  %4811 = vmatprep.mubr.msk.f32.mxu1 %vm597_vm2, %v4740_v46 }
  0xf3   : > { %4809 = vmatprep.subr.msk.mxu1 %vm597_vm2, %v4758_v45  ;;  %4819 = vmatmul.mubr.msk.f32.vlgmr.msra.gmra.mxu0 %vm597_vm2, %v359_v61 }
  0xf4   : > { %4829 = vmatpush3.xpose.msk.msra.mxu0 %vm597_vm2, %v475_v2  ;;  %4832 = vmatprep.mubr.msk.f32.mxu0 %vm597_vm2, %v372_v3 }
  0xf5   : > { %4830 = vmatprep.subr.msk.mxu0 %vm597_vm2, %v472_v62 }
  0xf6   : > { %4810 = vmatpush3.xpose.msk.msra.mxu1 %vm597_vm2, %v4758_v45 }
  0xf7   : > { %4821 = vmatprep.subr.msk.mxu1 %vm597_vm2, %v4763_v57 }
  0xf8   : > { %4831 = vmatpush3.xpose.msk.msra.mxu0 %vm597_vm2, %v472_v62 }
  0xf9   : > { %4812 = vmatmul.mubr.msk.f32.vlgmr.msra.gmra.mxu1 %vm597_vm2, %v4741_v50 }
  0xfa   : > { %4822 = vmatpush3.xpose.msk.msra.mxu1 %vm597_vm2, %v4763_v57  ;;  %4825 = vmatprep.mubr.msk.f32.mxu1 %vm597_vm2, %v4744_v54 }
  0xfb   : > { %4823 = vmatprep.subr.msk.mxu1 %vm597_vm2, %v4762_v53  ;;  %4833 = vmatmul.mubr.msk.f32.vlgmr.msra.gmra.mxu0 %vm597_vm2, %v375_v5 }
  0xfe   : > { %4824 = vmatpush3.xpose.msk.msra.mxu1 %vm597_vm2, %v4762_v53 }
  0xff   : > { %4835 = vmatprep.subr.msk.mxu1 %vm597_vm2, %v4767_v0 }
 0x101   : > { %4826 = vmatmul.mubr.msk.f32.vlgmr.msra.gmra.mxu1 %vm597_vm2, %v4745_v58 }
 0x102   : > { %4836 = vmatpush3.xpose.msk.msra.mxu1 %vm597_vm2, %v4767_v0  ;;  %4839 = vmatprep.mubr.msk.f32.mxu1 %vm597_vm2, %v4748_v63 }
 0x103   : > { %4837 = vmatprep.subr.msk.mxu1 %vm597_vm2, %v4766_v60 }
 0x106   : > { %4838 = vmatpush3.xpose.msk.msra.mxu1 %vm597_vm2, %v4766_v60 }
 0x109   : > { %4840 = vmatmul.mubr.msk.f32.vlgmr.msra.gmra.mxu1 %vm597_vm2, %v4749_v4 }
 0x14b   : > { %v4772_v6 = vpop.f32.mrf.mxu0 }
 0x14d   : > { %v534_v7 = vpop.f32.mrf.mxu0 }
 0x14f   : > { %v4773_v8 = vpop.f32.mrf.mxu0 }
 0x150   : > { %4849 = vmatprep.subr.mxu1 %v4773_v8 }
 0x151   : > { %v537_v10 = vpop.f32.mrf.mxu0  ;;  %4850 = vmatpush3.msra.mxu1 %v4773_v8 }
 0x152   : > { %4842 = vmatprep.subr.mxu0 %v537_v10  ;;  %4851 = vmatprep.subr.mxu1 %v4772_v6 }
 0x153   : > { %v5458_v11 = vpop.f32.mrf.mxu0  ;;  %4843 = vmatpush3.msra.mxu0 %v537_v10  ;;  %4852 = vmatpush3.msra.mxu1 %v4772_v6 }
 0x154   : > { %4844 = vmatprep.subr.mxu0 %v534_v7 }
 0x155   : > { %v5460_v12 = vpop.f32.mrf.mxu0  ;;  %4845 = vmatpush3.msra.mxu0 %v534_v7 }
 0x157   : > { %v5462_v14 = vpop.f32.mrf.mxu0 }
 0x158   : > { %4863 = vmatprep.subr.mxu1 %v5462_v14 }
 0x159   : > { %v5465_v15 = vpop.f32.mrf.mxu0 }
 0x15a   : > { %4856 = vmatprep.subr.mxu0 %v5465_v15 }
 0x15b   : > { %v5468_v20 = vpop.f32.mrf.mxu0 }
 0x15d   : > { %v5470_v22 = vpop.f32.mrf.mxu0 }
 0x15f   : > { %v5474_v28 = vpop.f32.mrf.mxu0 }
 0x161   : > { %v5484_v36 = vpop.f32.mrf.mxu0 }
 0x163   : > { %v5490_v40 = vpop.f32.mrf.mxu0 }
 0x165   : > { %v5496_v44 = vpop.f32.mrf.mxu0 }
 0x167   : > { %v5502_v48 = vpop.f32.mrf.mxu0 }
 0x169   : > { %v5508_v52 = vpop.f32.mrf.mxu0 }
 0x1a1   : > { %v4792_v16 = vpop.f32.mrf.mxu1 }
 0x1a2   : > { %v5486_v37 = vmul.f32 0.70710677, %v4792_v16 }
 0x1a3   : > { %v676_v21 = vpop.f32.mrf.mxu1 }
 0x1a4   : > { %v5476_v29 = vmul.f32 0.70710677, %v676_v21  ;;  %v1314_v43 = vsel %vm1310_vm3, %v5486_v37, -inf }
 0x1a6   : > { %v1311_v38 = vsel %vm1310_vm3, %v5476_v29, -inf }
 0x1a9   : > { %v4799_v23 = vpop.f32.mrf.mxu1 }
 0x1aa   : > { %v5472_v26 = vmul.f32 0.70710677, %v4799_v23 }
 0x1ab   : > { %v763_v27 = vpop.f32.mrf.mxu1 }
 0x1ac   : > { %v5478_v32 = vmul.f32 0.70710677, %v763_v27  ;;  %v1320_v33 = vsel %vm1310_vm3, %v5472_v26, -inf }
 0x1ad   : > { %1321 = vmax.xlane.f32.xlu1 %v1320_v33 }
 0x1ae   : > { %v1317_v35 = vsel %vm1310_vm3, %v5478_v32, -inf }
 0x1af   : > { %1318 = vmax.xlane.f32.xlu0 %v1317_v35 }
 0x1b1   : > { %1312 = vmax.xlane.f32.xlu1 %v1311_v38  ;;  %v4806_v39 = vpop.f32.mrf.mxu1 }
 0x1b2   : > { %v5528_v7 = vmul.f32 0.70710677, %v4806_v39 }
 0x1b3   : > { %v850_v41 = vpop.f32.mrf.mxu1  ;;  %v4820_v56 = vpop.f32.mrf.mxu0 }
 0x1b4   : > { %v5492_v42 = vmul.f32 0.70710677, %v850_v41  ;;  %v5536_v21 = vmul.f32 0.70710677, %v4820_v56  ;;  %v1326_v23 = vsel %vm1310_vm3, %v5528_v7, -inf }
 0x1b5   : > { %1315 = vmax.xlane.f32.xlu1 %v1314_v43  ;;  %v1024_v60 = vpop.f32.mrf.mxu0 }
 0x1b6   : > { %v1323_v45 = vsel %vm1310_vm3, %v5492_v42, -inf  ;;  %v5522_v3 = vmul.f32 0.70710677, %v1024_v60  ;;  %v1338_v35 = vsel %vm1310_vm3, %v5536_v21, -inf }
 0x1b8   : > { %v1335_v16 = vsel %vm1310_vm3, %v5522_v3, -inf }
 0x1b9   : > { %1324 = vmax.xlane.f32.xlu1 %v1323_v45  ;;  %v4813_v46 = vpop.f32.mrf.mxu1 }
 0x1ba   : > { %v5500_v47 = vmul.f32 0.70710677, %v4813_v46 }
 0x1bb   : > { %v937_v49 = vpop.f32.mrf.mxu1  ;;  %v4834_v62 = vpop.f32.mrf.mxu0 }
 0x1bc   : > { %v5504_v50 = vmul.f32 0.70710677, %v937_v49  ;;  %v1332_v51 = vsel %vm1310_vm3, %v5500_v47, -inf  ;;  %v5542_v33 = vmul.f32 0.70710677, %v4834_v62 }
 0x1bd   : > { %1333 = vmax.xlane.f32.xlu1 %v1332_v51  ;;  %v1198_v6 = vpop.f32.mrf.mxu0 }
 0x1be   : > { %v1329_v53 = vsel %vm1310_vm3, %v5504_v50, -inf  ;;  %v5532_v10 = vmul.f32 0.70710677, %v1198_v6  ;;  %v1350_v38 = vsel %vm1310_vm3, %v5542_v33, -inf }
 0x1c0   : > { %v1347_v27 = vsel %vm1310_vm3, %v5532_v10, -inf }
 0x1c1   : > { %1330 = vmax.xlane.f32.xlu1 %v1329_v53  ;;  %v4827_v54 = vpop.f32.mrf.mxu1 }
 0x1c2   : > { %v5512_v55 = vmul.f32 0.70710677, %v4827_v54 }
 0x1c3   : > { %v1111_v57 = vpop.f32.mrf.mxu1 }
 0x1c4   : > { %v5514_v58 = vmul.f32 0.70710677, %v1111_v57  ;;  %v1344_v59 = vsel %vm1310_vm3, %v5512_v55, -inf }
 0x1c5   : > { %1345 = vmax.xlane.f32.xlu1 %v1344_v59 }
 0x1c6   : > { %v1341_v61 = vsel %vm1310_vm3, %v5514_v58, -inf }
 0x1c9   : > { %1342 = vmax.xlane.f32.xlu1 %v1341_v61  ;;  %v4841_v63 = vpop.f32.mrf.mxu1 }
 0x1ca   : > { %v5520_v0 = vmul.f32 0.70710677, %v4841_v63 }
 0x1cb   : > { %v1285_v2 = vpop.f32.mrf.mxu1 }
 0x1cc   : > { %v5524_v4 = vmul.f32 0.70710677, %v1285_v2  ;;  %v1356_v5 = vsel %vm1310_vm3, %v5520_v0, -inf }
 0x1cd   : > { %1357 = vmax.xlane.f32.xlu0 %v1356_v5 }
 0x1ce   : > { %v1353_v8 = vsel %vm1310_vm3, %v5524_v4, -inf }
 0x1cf   : > { %1354 = vmax.xlane.f32.xlu1 %v1353_v8 }
 0x1d1   : > { %1336 = vmax.xlane.f32.xlu0 %v1335_v16 }
 0x1d3   : > { %1327 = vmax.xlane.f32.xlu1 %v1326_v23 }
 0x1d5   : > { %1348 = vmax.xlane.f32.xlu0 %v1347_v27 }
 0x1d7   : > { %1339 = vmax.xlane.f32.xlu1 %v1338_v35 }
 0x1db   : > { %1351 = vmax.xlane.f32.xlu1 %v1350_v38 }
 0x236   : > { %v1322_v39 = vpop.xlane.xlu1 %1321 }
 0x237   : > { %v1362_v54 = vsub.f32 %v5472_v26, %v1322_v39 }
 0x238   : > { %v1319_v41 = vpop.xlane.xlu0 %1318 }
 0x239   : > { %v1361_v43 = vsub.f32 %v5478_v32, %v1319_v41  ;;  %v1381_v60 = vmul.f32 1.442695, %v1362_v54 }
 0x23a   : > { %v1313_v45 = vpop.xlane.xlu1 %1312 }
 0x23b   : > { %v1379_v46 = vmul.f32 1.442695, %v1361_v43  ;;  %v1359_v49 = vsub.f32 %v5476_v29, %v1313_v45 }
 0x23d   : > { %5120 = vpow2.f32 %v1379_v46  ;;  %v1375_v56 = vmul.f32 1.442695, %v1359_v49 }
 0x23e   : > { %v1316_v51 = vpop.xlane.xlu1 %1315 }
 0x23f   : > { %v1360_v53 = vsub.f32 %v5486_v37, %v1316_v51 }
 0x241   : > { %v1377_v57 = vmul.f32 1.442695, %v1360_v53 }
 0x242   : > { %v1325_v59 = vpop.xlane.xlu1 %1324 }
 0x243   : > { %5122 = vpow2.f32 %v1377_v57  ;;  %v1363_v61 = vsub.f32 %v5492_v42, %v1325_v59 }
 0x244   : > { %5124 = vpow2.f32 %v1375_v56 }
 0x245   : > { %5126 = vpow2.f32 %v1381_v60  ;;  %v1383_v32 = vmul.f32 1.442695, %v1363_v61 }
 0x246   : > { %v1334_v62 = vpop.xlane.xlu1 %1333 }
 0x247   : > { %v1366_v63 = vsub.f32 %v5500_v47, %v1334_v62  ;;  %5128 = vpow2.f32 %v1383_v32 }
 0x249   : > { %v1389_v26 = vmul.f32 1.442695, %v1366_v63 }
 0x24a   : > { %v5554_v2 = vpop.eup %5120  ;;  %v1331_v29 = vpop.xlane.xlu1 %1330 }
 0x24b   : > { %v1413_v37 = vsel %vm1310_vm3, %v5554_v2, 0.0  ;;  %5130 = vpow2.f32 %v1389_v26  ;;  %v1365_v35 = vsub.f32 %v5504_v50, %v1331_v29 }
 0x24c   : > { %1414 = vadd.xlane.f32.xlu0 %v1413_v37 }
 0x24d   : > { %v1387_v46 = vmul.f32 1.442695, %v1365_v35 }
 0x24e   : > { %v1346_v5 = vpop.xlane.xlu1 %1345 }
 0x24f   : > { %v1370_v60 = vsub.f32 %v5512_v55, %v1346_v5 }
 0x250   : > { %v5558_v6 = vpop.eup %5122 }
 0x251   : > { %v1410_v42 = vsel %vm1310_vm3, %v5558_v6, 0.0  ;;  %v5562_v8 = vpop.eup %5124  ;;  %v1397_v63 = vmul.f32 1.442695, %v1370_v60 }
 0x252   : > { %1411 = vadd.xlane.f32.xlu1 %v1410_v42  ;;  %v1343_v47 = vpop.xlane.xlu1 %1342  ;;  %v1407_v16 = vsel %vm1310_vm3, %v5562_v8, 0.0  ;;  %v5566_v23 = vpop.eup %5126 }
 0x253   : > { %v1416_v39 = vsel %vm1310_vm3, %v5566_v23, 0.0  ;;  %v1369_v37 = vsub.f32 %v5514_v58, %v1343_v47 }
 0x254   : > { %v5571_v41 = vpop.eup %5128 }
 0x255   : > { %v1419_v54 = vsel %vm1310_vm3, %v5571_v41, 0.0  ;;  %v1395_v55 = vmul.f32 1.442695, %v1369_v37 }
 0x256   : > { %v1358_v27 = vpop.xlane.xlu0 %1357  ;;  %1408 = vadd.xlane.f32.xlu1 %v1407_v16 }
 0x257   : > { %v1374_v5 = vsub.f32 %v5520_v0, %v1358_v27 }
 0x258   : > { %v1355_v38 = vpop.xlane.xlu1 %1354  ;;  %v5577_v56 = vpop.eup %5130 }
 0x259   : > { %v1405_v16 = vmul.f32 1.442695, %v1374_v5  ;;  %v1373_v35 = vsub.f32 %v5524_v4, %v1355_v38 }
 0x25a   : > { %v1337_v43 = vpop.xlane.xlu0 %1336  ;;  %1417 = vadd.xlane.f32.xlu1 %v1416_v39 }
 0x25b   : > { %v1367_v45 = vsub.f32 %v5522_v3, %v1337_v43  ;;  %v1403_v27 = vmul.f32 1.442695, %v1373_v35 }
 0x25c   : > { %v1328_v49 = vpop.xlane.xlu1 %1327 }
 0x25d   : > { %v1391_v51 = vmul.f32 1.442695, %v1367_v45  ;;  %v1364_v53 = vsub.f32 %v5528_v7, %v1328_v49  ;;  %v1428_v7 = vsel %vm1310_vm3, %v5577_v56, 0.0 }
 0x25e   : > { %1420 = vadd.xlane.f32.xlu1 %v1419_v54  ;;  %v1349_v50 = vpop.xlane.xlu0 %1348 }
 0x25f   : > { %5132 = vpow2.f32 %v1391_v51  ;;  %v1385_v57 = vmul.f32 1.442695, %v1364_v53  ;;  %v1371_v59 = vsub.f32 %v5532_v10, %v1349_v50 }
 0x260   : > { %5134 = vpow2.f32 %v1387_v46  ;;  %v1340_v3 = vpop.xlane.xlu1 %1339 }
 0x261   : > { %5136 = vpow2.f32 %v1385_v57  ;;  %v1399_v61 = vmul.f32 1.442695, %v1371_v59  ;;  %v1368_v62 = vsub.f32 %v5536_v21, %v1340_v3  ;;  %v2150_v3 = vrot.slane %v5304_v1, %v5322_v9 }
 0x262   : > { %1429 = vadd.xlane.f32.xlu1 %v1428_v7 }
 0x263   : > { %v1393_v32 = vmul.f32 1.442695, %v1368_v62  ;;  %5138 = vpow2.f32 %v1399_v61 }
 0x264   : > { %v1352_v29 = vpop.xlane.xlu1 %1351 }
 0x265   : > { %5140 = vpow2.f32 %v1393_v32  ;;  %v1372_v10 = vsub.f32 %v5542_v33, %v1352_v29 }
 0x266   : > { %5142 = vpow2.f32 %v1397_v63 }
 0x267   : > { %v1401_v26 = vmul.f32 1.442695, %v1372_v10 }
 0x269   : > { %5144 = vpow2.f32 %v1401_v26 }
 0x26a   : > { %5146 = vpow2.f32 %v1395_v55 }
 0x26b   : > { %5148 = vpow2.f32 %v1405_v16 }
 0x26c   : > { %v5587_v21 = vpop.eup %5132  ;;  %5150 = vpow2.f32 %v1403_v27 }
 0x26d   : > { %v5589_v42 = vpop.eup %5134  ;;  %v1431_v58 = vsel %vm1310_vm3, %v5587_v21, 0.0 }
 0x26e   : > { %v5594_v47 = vpop.eup %5136  ;;  %1432 = vadd.xlane.f32.xlu0 %v1431_v58  ;;  %v1425_v39 = vsel %vm1310_vm3, %v5589_v42, 0.0 }
 0x26f   : > { %v1422_v33 = vsel %vm1310_vm3, %v5594_v47, 0.0 }
 0x270   : > { %1423 = vadd.xlane.f32.xlu1 %v1422_v33  ;;  %v5598_v0 = vpop.eup %5138 }
 0x271   : > { %v1443_v45 = vsel %vm1310_vm3, %v5598_v0, 0.0 }
 0x272   : > { %v5602_v43 = vpop.eup %5140  ;;  %1426 = vadd.xlane.f32.xlu0 %v1425_v39 }
 0x273   : > { %v1434_v4 = vsel %vm1310_vm3, %v5602_v43, 0.0  ;;  %v5606_v38 = vpop.eup %5142 }
 0x274   : > { %1435 = vadd.xlane.f32.xlu1 %v1434_v4  ;;  %v1440_v51 = vsel %vm1310_vm3, %v5606_v38, 0.0 }
 0x276   : > { %v5610_v46 = vpop.eup %5144  ;;  %1444 = vadd.xlane.f32.xlu0 %v1443_v45 }
 0x277   : > { %v1446_v49 = vsel %vm1310_vm3, %v5610_v46, 0.0  ;;  %v5616_v53 = vpop.eup %5146 }
 0x278   : > { %1447 = vadd.xlane.f32.xlu1 %v1446_v49  ;;  %v1437_v54 = vsel %vm1310_vm3, %v5616_v53, 0.0  ;;  %v5620_v50 = vpop.eup %5148 }
 0x279   : > { %v1452_v57 = vsel %vm1310_vm3, %v5620_v50, 0.0  ;;  %v5624_v59 = vpop.eup %5150 }
 0x27a   : > { %1441 = vadd.xlane.f32.xlu0 %v1440_v51  ;;  %v1449_v60 = vsel %vm1310_vm3, %v5624_v59, 0.0 }
 0x27e   : > { %1438 = vadd.xlane.f32.xlu0 %v1437_v54 }
 0x282   : > { %1453 = vadd.xlane.f32.xlu0 %v1452_v57 }
 0x286   : > { %1450 = vadd.xlane.f32.xlu0 %v1449_v60 }
 0x289   : > { %2151 = vrot.lane.b32.xlu1 %v2150_v3, %s5258_s30 }
 0x28d   : > { %2355 = vrot.lane.b32.xlu1 %v5337_v19, %s5259_s6 }
 0x29c   : > { %2253 = vrot.lane.b32.xlu0 %v5337_v19, %s5258_s30 }
 0x2d5   : > { %v1415_v61 = vpop.xlane.xlu0 %1414 }
 0x2d6   : > { %5152 = vrcp.f32 %v1415_v61 }
 0x2db   : > { %v1412_v62 = vpop.xlane.xlu1 %1411 }
 0x2dc   : > { %5154 = vrcp.f32 %v1412_v62 }
 0x2df   : > { %v1409_v7 = vpop.xlane.xlu1 %1408 }
 0x2e0   : > { %5156 = vrcp.f32 %v1409_v7 }
 0x2e3   : > { %v5153_v32 = vpop.eup %5152  ;;  %v1418_v63 = vpop.xlane.xlu1 %1417 }
 0x2e4   : > { %5158 = vrcp.f32 %v1418_v63  ;;  %v1460_v29 = vmul.f32 %v5153_v32, %v5554_v2 }
 0x2e6   : > { %4853 = vmatprep.mubr.msk.f32.mxu1 %vm1310_vm3, %v1460_v29 }
 0x2e7   : > { %v1421_v1 = vpop.xlane.xlu1 %1420 }
 0x2e8   : > { %5160 = vrcp.f32 %v1421_v1 }
 0x2e9   : > { %v5155_v37 = vpop.eup %5154 }
 0x2ea   : > { %v1458_v19 = vmul.f32 %v5155_v37, %v5558_v6 }
 0x2eb   : > { %v1430_v16 = vpop.xlane.xlu1 %1429 }
 0x2ed   : > { %v5157_v10 = vpop.eup %5156 }
 0x2ee   : > { %v1456_v26 = vmul.f32 %v5157_v10, %v5562_v8 }
 0x2f0   : > { %4846 = vmatprep.mubr.msk.f32.mxu0 %vm1310_vm3, %v1456_v26 }
 0x2f1   : > { %v5159_v55 = vpop.eup %5158  ;;  %4847 = vmatmul.mubr.msk.f32.vlgmr.msra.gmra.mxu0 %vm1310_vm3, %v1458_v19 }
 0x2f2   : > { %4857 = vmatpush3.msra.mxu0 %v5465_v15  ;;  %v1462_v5 = vmul.f32 %v5159_v55, %v5566_v23 }
 0x2f3   : > { %4858 = vmatprep.subr.mxu0 %v5460_v12 }
 0x2f4   : > { %4859 = vmatpush3.msra.mxu0 %v5460_v12  ;;  %4854 = vmatmul.mubr.msk.f32.vlgmr.msra.gmra.mxu1 %vm1310_vm3, %v1462_v5 }
 0x2f5   : > { %v5161_v2 = vpop.eup %5160  ;;  %4864 = vmatpush3.msra.mxu1 %v5462_v14  ;;  %4870 = vmatprep.subr.mxu0 %v5484_v36 }
 0x2f6   : > { %4865 = vmatprep.subr.mxu1 %v5458_v11  ;;  %v1464_v6 = vmul.f32 %v5161_v2, %v5571_v41 }
 0x2f7   : > { %4866 = vmatpush3.msra.mxu1 %v5458_v11  ;;  %v1433_v15 = vpop.xlane.xlu0 %1432 }
 0x2f8   : > { %4877 = vmatprep.subr.mxu1 %v5474_v28  ;;  %4860 = vmatprep.mubr.msk.f32.mxu0 %vm1310_vm3, %v1464_v6  ;;  %5162 = vrcp.f32 %v1433_v15 }
 0x2f9   : > { %v1424_v12 = vpop.xlane.xlu1 %1423 }
 0x2fa   : > { %5164 = vrcp.f32 %v1424_v12 }
 0x2fb   : > { %5166 = vrcp.f32 %v1430_v16  ;;  %v1427_v8 = vpop.xlane.xlu0 %1426 }
 0x2fc   : > { %5168 = vrcp.f32 %v1427_v8 }
 0x2fd   : > { %v1436_v14 = vpop.xlane.xlu1 %1435 }
 0x2fe   : > { %5170 = vrcp.f32 %v1436_v14 }
 0x2ff   : > { %v1445_v23 = vpop.xlane.xlu0 %1444 }
 0x300   : > { %5172 = vrcp.f32 %v1445_v23 }
 0x301   : > { %v1448_v35 = vpop.xlane.xlu1 %1447 }
 0x302   : > { %5174 = vrcp.f32 %v1448_v35 }
 0x303   : > { %v1442_v41 = vpop.xlane.xlu0 %1441 }
 0x304   : > { %5176 = vrcp.f32 %v1442_v41 }
 0x305   : > { %v5163_v58 = vpop.eup %5162 }
 0x306   : > { %v1472_v45 = vmul.f32 %v5163_v58, %v5587_v21  ;;  %v2152_v21 = vpop.permute.xlu1 %2151 }
 0x307   : > { %v5165_v11 = vpop.eup %5164  ;;  %v1439_v33 = vpop.xlane.xlu0 %1438 }
 0x308   : > { %v5167_v27 = vpop.eup %5166  ;;  %5178 = vrcp.f32 %v1439_v33  ;;  %v1466_v39 = vmul.f32 %v5165_v11, %v5594_v47 }
 0x309   : > { %v5169_v4 = vpop.eup %5168  ;;  %v1470_v57 = vmul.f32 %v5167_v27, %v5577_v56 }
 0x30a   : > { %4861 = vmatmul.mubr.msk.f32.vlgmr.msra.gmra.mxu0 %vm1310_vm3, %v1466_v39  ;;  %v1468_v49 = vmul.f32 %v5169_v4, %v5589_v42 }
 0x30b   : > { %v5171_v51 = vpop.eup %5170  ;;  %4871 = vmatpush3.msra.mxu0 %v5484_v36  ;;  %4874 = vmatprep.mubr.msk.f32.mxu0 %vm1310_vm3, %v1472_v45  ;;  %v1454_v54 = vpop.xlane.xlu0 %1453 }
 0x30c   : > { %4872 = vmatprep.subr.mxu0 %v5470_v22  ;;  %4867 = vmatprep.mubr.msk.f32.mxu1 %vm1310_vm3, %v1468_v49  ;;  %v1474_v47 = vmul.f32 %v5171_v51, %v5602_v43  ;;  %5180 = vrcp.f32 %v1454_v54 }
 0x30d   : > { %v5173_v60 = vpop.eup %5172  ;;  %4873 = vmatpush3.msra.mxu0 %v5470_v22  ;;  %4868 = vmatmul.mubr.msk.f32.vlgmr.msra.gmra.mxu1 %vm1310_vm3, %v1470_v57 }
 0x30e   : > { %4878 = vmatpush3.msra.mxu1 %v5474_v28  ;;  %4884 = vmatprep.subr.mxu0 %v5508_v52  ;;  %v1480_v36 = vmul.f32 %v5173_v60, %v5598_v0  ;;  %v2154_v28 = vsel %vm286_vm0, %v2152_v21, 0 }
 0x30f   : > { %v5175_v42 = vpop.eup %5174  ;;  %4875 = vmatmul.mubr.msk.f32.vlgmr.msra.gmra.mxu0 %vm1310_vm3, %v1474_v47  ;;  %4879 = vmatprep.subr.mxu1 %v5468_v20  ;;  %v1451_v56 = vpop.xlane.xlu0 %1450 }
 0x310   : > { %4885 = vmatpush3.msra.mxu0 %v5508_v52  ;;  %4880 = vmatpush3.msra.mxu1 %v5468_v20  ;;  %5182 = vrcp.f32 %v1451_v56  ;;  %v1482_v22 = vmul.f32 %v5175_v42, %v5610_v46 }
 0x311   : > { %4886 = vmatprep.subr.mxu0 %v5496_v44  ;;  %4888 = vmatprep.mubr.msk.f32.mxu0 %vm1310_vm3, %v1480_v36  ;;  %v5177_v52 = vpop.eup %5176 }
 0x312   : > { %4887 = vmatpush3.msra.mxu0 %v5496_v44  ;;  %4891 = vmatprep.subr.mxu1 %v5502_v48  ;;  %v1478_v43 = vmul.f32 %v5177_v52, %v5606_v38 }
 0x313   : > { %4889 = vmatmul.mubr.msk.f32.vlgmr.msra.gmra.mxu0 %vm1310_vm3, %v1482_v22  ;;  %5103 = vmatprep.subr.msk.bf16.mxu0 %vm286_vm0, %v2152_v21  ;;  %v2254_v44 = vpop.permute.xlu0 %2253 }
 0x314   : > { %4899 = vmatpush3.bf16.msra.mxu0 %v2154_v28  ;;  %4900 = vmatprep.mubr.msk.bf16.mxu0 %vm261_vm1, %v5327_v13  ;;  %v2256_v3 = vsel %vm286_vm0, %v2254_v44, 0 }
 0x315   : > { %v5179_v20 = vpop.eup %5178 }
 0x316   : > { %v1476_v0 = vmul.f32 %v5179_v20, %v5616_v53 }
 0x317   : > { %4901 = vmatmul.mubr.msk.bf16.vlgmr.msra.gmra.mxu0 %vm261_vm1, %v5332_v17 }
 0x318   : > { %4881 = vmatprep.mubr.msk.f32.mxu1 %vm1310_vm3, %v1476_v0  ;;  %4904 = vmatprep.mubr.msk.bf16.mxu0 %vm261_vm1, %v5334_v18 }
 0x319   : > { %4882 = vmatmul.mubr.msk.f32.vlgmr.msra.gmra.mxu1 %vm1310_vm3, %v1478_v43  ;;  %v5181_v46 = vpop.eup %5180 }
 0x31a   : > { %4892 = vmatpush3.msra.mxu1 %v5502_v48  ;;  %v1486_v61 = vmul.f32 %v5181_v46, %v5620_v50 }
 0x31b   : > { %4893 = vmatprep.subr.mxu1 %v5490_v40 }
 0x31c   : > { %4894 = vmatpush3.msra.mxu1 %v5490_v40  ;;  %v2356_v40 = vpop.permute.xlu1 %2355 }
 0x31d   : > { %v5183_v53 = vpop.eup %5182  ;;  %5104 = vmatprep.subr.msk.bf16.mxu1 %vm286_vm0, %v2254_v44  ;;  %v2358_v48 = vsel %vm286_vm0, %v2356_v40, 0  ;;  %5105 = vmatprep.subr.msk.bf16.mxu0 %vm286_vm0, %v2356_v40 }
 0x31e   : > { %v1484_v38 = vmul.f32 %v5183_v53, %v5624_v59  ;;  %4935 = vmatpush3.bf16.msra.mxu0 %v2358_v48 }
 0x31f   : > { %4905 = vmatmul.mubr.msk.bf16.gmra.mxu0 %vm261_vm1, %v5356_v24 }
 0x320   : > { %4895 = vmatprep.mubr.msk.f32.mxu1 %vm1310_vm3, %v1484_v38  ;;  %4908 = vmatprep.mubr.msk.bf16.mxu0 %vm261_vm1, %v5358_v25 }
 0x321   : > { %4896 = vmatmul.mubr.msk.f32.vlgmr.msra.gmra.mxu1 %vm1310_vm3, %v1486_v61 }
 0x322   : > { %4917 = vmatpush3.bf16.msra.mxu1 %v2256_v3  ;;  %4918 = vmatprep.mubr.msk.bf16.mxu1 %vm261_vm1, %v5327_v13 }
 0x325   : > { %4919 = vmatmul.mubr.msk.bf16.vlgmr.msra.gmra.mxu1 %vm261_vm1, %v5332_v17 }
 0x326   : > { %4922 = vmatprep.mubr.msk.bf16.mxu1 %vm261_vm1, %v5334_v18 }
 0x327   : > { %4909 = vmatmul.mubr.msk.bf16.gmra.mxu0 %vm261_vm1, %v5372_v30 }
 0x328   : > { %4912 = vmatprep.mubr.msk.bf16.mxu0 %vm261_vm1, %v5374_v31 }
 0x32d   : > { %4923 = vmatmul.mubr.msk.bf16.gmra.mxu1 %vm261_vm1, %v5356_v24 }
 0x32e   : > { %4926 = vmatprep.mubr.msk.bf16.mxu1 %vm261_vm1, %v5358_v25 }
 0x32f   : > { %4913 = vmatmul.mubr.msk.bf16.gmra.mxu0 %vm261_vm1, %v5386_v34 }
 0x330   : > { %4936 = vmatprep.mubr.msk.bf16.mxu0 %vm261_vm1, %v5327_v13 }
 0x335   : > { %4927 = vmatmul.mubr.msk.bf16.gmra.mxu1 %vm261_vm1, %v5372_v30 }
 0x336   : > { %4930 = vmatprep.mubr.msk.bf16.mxu1 %vm261_vm1, %v5374_v31 }
 0x337   : > { %4937 = vmatmul.mubr.msk.bf16.vlgmr.msra.gmra.mxu0 %vm261_vm1, %v5332_v17 }
 0x338   : > { %4940 = vmatprep.mubr.msk.bf16.mxu0 %vm261_vm1, %v5334_v18 }
 0x33d   : > { %4931 = vmatmul.mubr.msk.bf16.gmra.mxu1 %vm261_vm1, %v5386_v34 }
 0x33f   : > { %4941 = vmatmul.mubr.msk.bf16.gmra.mxu0 %vm261_vm1, %v5356_v24 }
 0x340   : > { %4944 = vmatprep.mubr.msk.bf16.mxu0 %vm261_vm1, %v5358_v25 }
 0x347   : > { %4945 = vmatmul.mubr.msk.bf16.gmra.mxu0 %vm261_vm1, %v5372_v30 }
 0x348   : > { %4948 = vmatprep.mubr.msk.bf16.mxu0 %vm261_vm1, %v5374_v31 }
 0x34f   : > { %4949 = vmatmul.mubr.msk.bf16.gmra.mxu0 %vm261_vm1, %v5386_v34 }
 0x3b1   : > { %v5740_v13 = vpop.f32.mrf.mxu0 }
 0x3b3   : > { %v5742_v17 = vpop.f32.mrf.mxu0 }
 0x3b4   : > { %v2135_v18 = vpack.c.bf16 %v5740_v13, %v5742_v17  ;;  %v5746_v24 = vpop.f32.mrf.mxu1 }
 0x3b6   : > { %v5748_v50 = vpop.f32.mrf.mxu1 }
 0x3b7   : > { %v2136_v25 = vpack.c.bf16 %v5746_v24, %v5748_v50 }
 0x3ca   : > { %v5752_v30 = vpop.f32.mrf.mxu0 }
 0x3cc   : > { %v5754_v31 = vpop.f32.mrf.mxu0 }
 0x3cd   : > { %v2137_v34 = vpack.c.bf16 %v5752_v30, %v5754_v31  ;;  %v5758_v59 = vpop.f32.mrf.mxu1 }
 0x3cf   : > { %v5760_v62 = vpop.f32.mrf.mxu0  ;;  %v5762_v7 = vpop.f32.mrf.mxu1 }
 0x3d0   : > { %v2138_v32 = vpack.c.bf16 %v5758_v59, %v5762_v7 }
 0x3d1   : > { %v5766_v63 = vpop.f32.mrf.mxu0 }
 0x3d2   : > { %v2139_v29 = vpack.c.bf16 %v5760_v62, %v5766_v63 }
 0x3d3   : > { %v5770_v1 = vpop.f32.mrf.mxu0 }
 0x3d5   : > { %v5772_v37 = vpop.f32.mrf.mxu0 }
 0x3d6   : > { %v6178_v17 = vpack.c.bf16 %v5770_v1, %v5772_v37 }
 0x3d7   : > { %v4902_v26 = vpop.f32.mrf.mxu0 }
 0x3d9   : > { %v5776_v19 = vpop.f32.mrf.mxu1  ;;  %v2190_v55 = vpop.f32.mrf.mxu0 }
 0x3da   : > { %4956 = vmatprep.mubr.msk.f32.mxu1 %vm597_vm2, %v2190_v55 }
 0x3db   : > { %v5779_v5 = vpop.f32.mrf.mxu1  ;;  %v4903_v2 = vpop.f32.mrf.mxu0 }
 0x3dc   : > { %v6177_v13 = vpack.c.bf16 %v5776_v19, %v5779_v5 }
 0x3dd   : > { %v2193_v6 = vpop.f32.mrf.mxu0 }
 0x3df   : > { %v4906_v15 = vpop.f32.mrf.mxu0 }
 0x3e1   : > { %v5783_v12 = vpop.f32.mrf.mxu1  ;;  %v2206_v8 = vpop.f32.mrf.mxu0 }
 0x3e3   : > { %v5785_v14 = vpop.f32.mrf.mxu1  ;;  %v4907_v23 = vpop.f32.mrf.mxu0 }
 0x3e5   : > { %v4920_v41 = vpop.f32.mrf.mxu1  ;;  %v2209_v58 = vpop.f32.mrf.mxu0 }
 0x3e7   : > { %v2292_v11 = vpop.f32.mrf.mxu1  ;;  %v4910_v33 = vpop.f32.mrf.mxu0 }
 0x3e9   : > { %v4921_v27 = vpop.f32.mrf.mxu1  ;;  %v2222_v39 = vpop.f32.mrf.mxu0 }
 0x3ea   : > { %4984 = vmatprep.mubr.msk.f32.mxu0 %vm597_vm2, %v2222_v39 }
 0x3eb   : > { %v2295_v4 = vpop.f32.mrf.mxu1  ;;  %v4911_v36 = vpop.f32.mrf.mxu0 }
 0x3ec   : > { %4952 = vmatprep.subr.msk.mxu1 %vm597_vm2, %v2295_v4 }
 0x3ed   : > { %v4924_v45 = vpop.f32.mrf.mxu1  ;;  %4953 = vmatpush3.xpose.msk.msra.mxu1 %vm597_vm2, %v2295_v4  ;;  %v2225_v56 = vpop.f32.mrf.mxu0 }
 0x3ee   : > { %4954 = vmatprep.subr.msk.mxu1 %vm597_vm2, %v2292_v11 }
 0x3ef   : > { %v2308_v49 = vpop.f32.mrf.mxu1  ;;  %v4914_v28 = vpop.f32.mrf.mxu0 }
 0x3f1   : > { %v4925_v51 = vpop.f32.mrf.mxu1  ;;  %4955 = vmatpush3.xpose.msk.msra.mxu1 %vm597_vm2, %v2292_v11  ;;  %v2238_v0 = vpop.f32.mrf.mxu0 }
 0x3f2   : > { %4959 = vmatprep.subr.msk.mxu1 %vm597_vm2, %v4921_v27 }
 0x3f3   : > { %v2311_v54 = vpop.f32.mrf.mxu1  ;;  %v4915_v43 = vpop.f32.mrf.mxu0 }
 0x3f4   : > { %4957 = vmatmul.mubr.msk.f32.vlgmr.msra.gmra.mxu1 %vm597_vm2, %v2193_v6 }
 0x3f5   : > { %v4928_v57 = vpop.f32.mrf.mxu1  ;;  %4960 = vmatpush3.xpose.msk.msra.mxu1 %vm597_vm2, %v4921_v27  ;;  %4963 = vmatprep.mubr.msk.f32.mxu1 %vm597_vm2, %v4902_v26  ;;  %v2241_v44 = vpop.f32.mrf.mxu0 }
 0x3f6   : > { %4961 = vmatprep.subr.msk.mxu1 %vm597_vm2, %v4920_v41 }
 0x3f7   : > { %v2324_v47 = vpop.f32.mrf.mxu1  ;;  %v4938_v46 = vpop.f32.mrf.mxu0 }
 0x3f9   : > { %v4929_v60 = vpop.f32.mrf.mxu1  ;;  %4962 = vmatpush3.xpose.msk.msra.mxu1 %vm597_vm2, %v4920_v41  ;;  %v2394_v53 = vpop.f32.mrf.mxu0 }
 0x3fa   : > { %4966 = vmatprep.subr.msk.mxu1 %vm597_vm2, %v2311_v54 }
 0x3fb   : > { %v2327_v21 = vpop.f32.mrf.mxu1  ;;  %v4939_v38 = vpop.f32.mrf.mxu0 }
 0x3fc   : > { %4964 = vmatmul.mubr.msk.f32.vlgmr.msra.gmra.mxu1 %vm597_vm2, %v4903_v2  ;;  %4980 = vmatprep.subr.msk.mxu0 %vm597_vm2, %v2327_v21 }
 0x3fd   : > { %4967 = vmatpush3.xpose.msk.msra.mxu1 %vm597_vm2, %v2311_v54  ;;  %4981 = vmatpush3.xpose.msk.msra.mxu0 %vm597_vm2, %v2327_v21  ;;  %v4932_v42 = vpop.f32.mrf.mxu1  ;;  %v2397_v3 = vpop.f32.mrf.mxu0 }
 0x3fe   : > { %4968 = vmatprep.subr.msk.mxu1 %vm597_vm2, %v2308_v49  ;;  %4982 = vmatprep.subr.msk.mxu0 %vm597_vm2, %v2324_v47 }
 0x3ff   : > { %4970 = vmatprep.mubr.msk.f32.mxu1 %vm597_vm2, %v2206_v8  ;;  %v2340_v22 = vpop.f32.mrf.mxu1  ;;  %v5836_v61 = vpop.f32.mrf.mxu0 }
 0x401   : > { %4969 = vmatpush3.xpose.msk.msra.mxu1 %vm597_vm2, %v2308_v49  ;;  %4983 = vmatpush3.xpose.msk.msra.mxu0 %vm597_vm2, %v2324_v47  ;;  %v4933_v52 = vpop.f32.mrf.mxu1  ;;  %v5838_v40 = vpop.f32.mrf.mxu0 }
 0x402   : > { %4973 = vmatprep.subr.msk.mxu1 %vm597_vm2, %v4925_v51 }
 0x403   : > { %v2343_v20 = vpop.f32.mrf.mxu1  ;;  %v5840_v48 = vpop.f32.mrf.mxu0 }
 0x404   : > { %4971 = vmatmul.mubr.msk.f32.vlgmr.msra.gmra.mxu1 %vm597_vm2, %v2209_v58  ;;  %4985 = vmatmul.mubr.msk.f32.vlgmr.msra.gmra.mxu0 %vm597_vm2, %v2225_v56 }
 0x405   : > { %4974 = vmatpush3.xpose.msk.msra.mxu1 %vm597_vm2, %v4925_v51  ;;  %4977 = vmatprep.mubr.msk.f32.mxu1 %vm597_vm2, %v4906_v15  ;;  %v5843_v26 = vpop.f32.mrf.mxu0 }
 0x406   : > { %4975 = vmatprep.subr.msk.mxu1 %vm597_vm2, %v4924_v45  ;;  %4994 = vmatprep.subr.msk.mxu0 %vm597_vm2, %v2343_v20 }
 0x407   : > { %4995 = vmatpush3.xpose.msk.msra.mxu0 %vm597_vm2, %v2343_v20  ;;  %4998 = vmatprep.mubr.msk.f32.mxu0 %vm597_vm2, %v2238_v0  ;;  %v5846_v55 = vpop.f32.mrf.mxu0 }
 0x408   : > { %4996 = vmatprep.subr.msk.mxu0 %vm597_vm2, %v2340_v22 }
 0x409   : > { %4976 = vmatpush3.xpose.msk.msra.mxu1 %vm597_vm2, %v4924_v45  ;;  %v5848_v2 = vpop.f32.mrf.mxu0 }
 0x40a   : > { %4987 = vmatprep.subr.msk.mxu1 %vm597_vm2, %v4929_v60 }
 0x40b   : > { %4997 = vmatpush3.xpose.msk.msra.mxu0 %vm597_vm2, %v2340_v22  ;;  %v5850_v6 = vpop.f32.mrf.mxu0 }
 0x40c   : > { %4978 = vmatmul.mubr.msk.f32.vlgmr.msra.gmra.mxu1 %vm597_vm2, %v4907_v23  ;;  %5008 = vmatprep.subr.mxu0 %v2397_v3 }
 0x40d   : > { %4988 = vmatpush3.xpose.msk.msra.mxu1 %vm597_vm2, %v4929_v60  ;;  %4991 = vmatprep.mubr.msk.f32.mxu1 %vm597_vm2, %v4910_v33  ;;  %v5854_v41 = vpop.f32.mrf.mxu0 }
 0x40e   : > { %4989 = vmatprep.subr.msk.mxu1 %vm597_vm2, %v4928_v57  ;;  %4999 = vmatmul.mubr.msk.f32.vlgmr.msra.gmra.mxu0 %vm597_vm2, %v2241_v44 }
 0x40f   : > { %5009 = vmatpush3.msra.mxu0 %v2397_v3  ;;  %v5862_v27 = vpop.f32.mrf.mxu0 }
 0x410   : > { %5010 = vmatprep.subr.mxu0 %v2394_v53 }
 0x411   : > { %4990 = vmatpush3.xpose.msk.msra.mxu1 %vm597_vm2, %v4928_v57  ;;  %5011 = vmatpush3.msra.mxu0 %v2394_v53  ;;  %v5864_v45 = vpop.f32.mrf.mxu0 }
 0x412   : > { %5001 = vmatprep.subr.msk.mxu1 %vm597_vm2, %v4933_v52  ;;  %5022 = vmatprep.subr.mxu0 %v5843_v26 }
 0x413   : > { %v5872_v57 = vpop.f32.mrf.mxu0 }
 0x414   : > { %4992 = vmatmul.mubr.msk.f32.vlgmr.msra.gmra.mxu1 %vm597_vm2, %v4911_v36 }
 0x415   : > { %5002 = vmatpush3.xpose.msk.msra.mxu1 %vm597_vm2, %v4933_v52  ;;  %5005 = vmatprep.mubr.msk.f32.mxu1 %vm597_vm2, %v4914_v28 }
 0x416   : > { %5003 = vmatprep.subr.msk.mxu1 %vm597_vm2, %v4932_v42 }
 0x419   : > { %5004 = vmatpush3.xpose.msk.msra.mxu1 %vm597_vm2, %v4932_v42  ;;  %v5878_v42 = vpop.f32.mrf.mxu0 }
 0x41a   : > { %5015 = vmatprep.subr.mxu1 %v4939_v38 }
 0x41c   : > { %5006 = vmatmul.mubr.msk.f32.vlgmr.msra.gmra.mxu1 %vm597_vm2, %v4915_v43 }
 0x41d   : > { %5016 = vmatpush3.msra.mxu1 %v4939_v38 }
 0x41e   : > { %5017 = vmatprep.subr.mxu1 %v4938_v46 }
 0x41f   : > { %5018 = vmatpush3.msra.mxu1 %v4938_v46 }
 0x420   : > { %5029 = vmatprep.subr.mxu1 %v5840_v48 }
 0x4b4   : > { %v4958_v15 = vpop.f32.mrf.mxu1 }
 0x4b5   : > { %v5852_v8 = vmul.f32 0.70710677, %v4958_v15 }
 0x4b6   : > { %v2535_v23 = vpop.f32.mrf.mxu1 }
 0x4b7   : > { %v5856_v58 = vmul.f32 0.70710677, %v2535_v23  ;;  %v3172_v11 = vsel %vm1310_vm3, %v5852_v8, -inf }
 0x4b8   : > { %3173 = vmax.xlane.f32.xlu1 %v3172_v11 }
 0x4b9   : > { %v3169_v33 = vsel %vm1310_vm3, %v5856_v58, -inf }
 0x4ba   : > { %3170 = vmax.xlane.f32.xlu0 %v3169_v33 }
 0x4bc   : > { %v4965_v39 = vpop.f32.mrf.mxu1 }
 0x4bd   : > { %v5868_v51 = vmul.f32 0.70710677, %v4965_v39 }
 0x4be   : > { %v2622_v4 = vpop.f32.mrf.mxu1 }
 0x4bf   : > { %v5866_v49 = vmul.f32 0.70710677, %v2622_v4  ;;  %v3178_v36 = vsel %vm1310_vm3, %v5868_v51, -inf }
 0x4c1   : > { %v3175_v54 = vsel %vm1310_vm3, %v5866_v49, -inf }
 0x4c2   : > { %3176 = vmax.xlane.f32.xlu0 %v3175_v54 }
 0x4c4   : > { %v4972_v47 = vpop.f32.mrf.mxu1  ;;  %v4986_v52 = vpop.f32.mrf.mxu0 }
 0x4c5   : > { %v5874_v60 = vmul.f32 0.70710677, %v4972_v47  ;;  %v5890_v53 = vmul.f32 0.70710677, %v4986_v52 }
 0x4c6   : > { %3179 = vmax.xlane.f32.xlu0 %v3178_v36  ;;  %v2709_v21 = vpop.f32.mrf.mxu1  ;;  %v2883_v44 = vpop.f32.mrf.mxu0 }
 0x4c7   : > { %v5880_v56 = vmul.f32 0.70710677, %v2709_v21  ;;  %v3184_v22 = vsel %vm1310_vm3, %v5874_v60, -inf  ;;  %v5894_v3 = vmul.f32 0.70710677, %v2883_v44  ;;  %v3196_v11 = vsel %vm1310_vm3, %v5890_v53, -inf }
 0x4c9   : > { %v3181_v28 = vsel %vm1310_vm3, %v5880_v56, -inf  ;;  %v3193_v4 = vsel %vm1310_vm3, %v5894_v3, -inf }
 0x4ca   : > { %3185 = vmax.xlane.f32.xlu0 %v3184_v22  ;;  %3182 = vmax.xlane.f32.xlu1 %v3181_v28 }
 0x4cc   : > { %v4979_v20 = vpop.f32.mrf.mxu1 }
 0x4cd   : > { %v5886_v0 = vmul.f32 0.70710677, %v4979_v20 }
 0x4ce   : > { %v2796_v43 = vpop.f32.mrf.mxu1  ;;  %v5000_v23 = vpop.f32.mrf.mxu0 }
 0x4cf   : > { %v5888_v46 = vmul.f32 0.70710677, %v2796_v43  ;;  %v3190_v38 = vsel %vm1310_vm3, %v5886_v0, -inf  ;;  %v5906_v21 = vmul.f32 0.70710677, %v5000_v23 }
 0x4d0   : > { %3191 = vmax.xlane.f32.xlu0 %v3190_v38  ;;  %v3057_v47 = vpop.f32.mrf.mxu0 }
 0x4d1   : > { %v3187_v15 = vsel %vm1310_vm3, %v5888_v46, -inf  ;;  %v5910_v28 = vmul.f32 0.70710677, %v3057_v47  ;;  %v3208_v20 = vsel %vm1310_vm3, %v5906_v21, -inf }
 0x4d2   : > { %3188 = vmax.xlane.f32.xlu1 %v3187_v15 }
 0x4d3   : > { %v3205_v38 = vsel %vm1310_vm3, %v5910_v28, -inf }
 0x4d4   : > { %3197 = vmax.xlane.f32.xlu0 %v3196_v11  ;;  %v4993_v33 = vpop.f32.mrf.mxu1 }
 0x4d5   : > { %v5900_v39 = vmul.f32 0.70710677, %v4993_v33 }
 0x4d6   : > { %3194 = vmax.xlane.f32.xlu1 %v3193_v4  ;;  %v2970_v54 = vpop.f32.mrf.mxu1 }
 0x4d7   : > { %v5904_v36 = vmul.f32 0.70710677, %v2970_v54  ;;  %v3202_v22 = vsel %vm1310_vm3, %v5900_v39, -inf }
 0x4d8   : > { %3203 = vmax.xlane.f32.xlu0 %v3202_v22 }
 0x4d9   : > { %v3199_v52 = vsel %vm1310_vm3, %v5904_v36, -inf }
 0x4da   : > { %3200 = vmax.xlane.f32.xlu1 %v3199_v52 }
 0x4dc   : > { %3209 = vmax.xlane.f32.xlu0 %v3208_v20  ;;  %v5007_v43 = vpop.f32.mrf.mxu1 }
 0x4dd   : > { %v5916_v44 = vmul.f32 0.70710677, %v5007_v43 }
 0x4de   : > { %3206 = vmax.xlane.f32.xlu1 %v3205_v38  ;;  %v3144_v15 = vpop.f32.mrf.mxu1 }
 0x4df   : > { %v5920_v23 = vmul.f32 0.70710677, %v3144_v15  ;;  %v3214_v11 = vsel %vm1310_vm3, %v5916_v44, -inf }
 0x4e0   : > { %3215 = vmax.xlane.f32.xlu0 %v3214_v11 }
 0x4e1   : > { %v3211_v33 = vsel %vm1310_vm3, %v5920_v23, -inf }
 0x4e2   : > { %3212 = vmax.xlane.f32.xlu1 %v3211_v33 }
 0x541   : > { %v3174_v4 = vpop.xlane.xlu1 %3173 }
 0x542   : > { %v3218_v54 = vsub.f32 %v5852_v8, %v3174_v4 }
 0x543   : > { %v3171_v47 = vpop.xlane.xlu0 %3170 }
 0x544   : > { %v3235_v22 = vmul.f32 1.442695, %v3218_v54  ;;  %v3217_v52 = vsub.f32 %v5856_v58, %v3171_v47 }
 0x546   : > { %5184 = vpow2.f32 %v3235_v22  ;;  %v3233_v20 = vmul.f32 1.442695, %v3217_v52 }
 0x548   : > { %5186 = vpow2.f32 %v3233_v20 }
 0x54b   : > { %v3177_v43 = vpop.xlane.xlu0 %3176 }
 0x54c   : > { %v3219_v38 = vsub.f32 %v5866_v49, %v3177_v43 }
 0x54e   : > { %v3237_v15 = vmul.f32 1.442695, %v3219_v38 }
 0x54f   : > { %v3180_v35 = vpop.xlane.xlu0 %3179 }
 0x550   : > { %5188 = vpow2.f32 %v3237_v15  ;;  %v3220_v11 = vsub.f32 %v5868_v51, %v3180_v35 }
 0x552   : > { %v3239_v10 = vmul.f32 1.442695, %v3220_v11 }
 0x553   : > { %v5930_v33 = vpop.eup %5184  ;;  %v3186_v16 = vpop.xlane.xlu0 %3185 }
 0x554   : > { %v3183_v8 = vpop.xlane.xlu1 %3182  ;;  %5190 = vpow2.f32 %v3239_v10  ;;  %v3222_v4 = vsub.f32 %v5874_v60, %v3186_v16  ;;  %v3268_v54 = vsel %vm1310_vm3, %v5930_v33, 0.0 }
 0x555   : > { %v3221_v58 = vsub.f32 %v5880_v56, %v3183_v8  ;;  %v5936_v47 = vpop.eup %5186  ;;  %3269 = vadd.xlane.f32.xlu0 %v3268_v54 }
 0x556   : > { %v3243_v49 = vmul.f32 1.442695, %v3222_v4  ;;  %v3265_v35 = vsel %vm1310_vm3, %v5936_v47, 0.0 }
 0x557   : > { %v3241_v22 = vmul.f32 1.442695, %v3221_v58  ;;  %3266 = vadd.xlane.f32.xlu1 %v3265_v35 }
 0x558   : > { %5192 = vpow2.f32 %v3243_v49 }
 0x559   : > { %5194 = vpow2.f32 %v3241_v22  ;;  %v3192_v51 = vpop.xlane.xlu0 %3191 }
 0x55a   : > { %v3224_v10 = vsub.f32 %v5886_v0, %v3192_v51 }
 0x55b   : > { %v3189_v16 = vpop.xlane.xlu1 %3188 }
 0x55c   : > { %v3247_v60 = vmul.f32 1.442695, %v3224_v10  ;;  %v3223_v56 = vsub.f32 %v5888_v46, %v3189_v16 }
 0x55d   : > { %v5942_v52 = vpop.eup %5188  ;;  %v3198_v20 = vpop.xlane.xlu0 %3197 }
 0x55e   : > { %5196 = vpow2.f32 %v3247_v60  ;;  %v3245_v43 = vmul.f32 1.442695, %v3223_v56  ;;  %v3226_v38 = vsub.f32 %v5890_v53, %v3198_v20  ;;  %v3271_v15 = vsel %vm1310_vm3, %v5942_v52, 0.0 }
 0x55f   : > { %v3195_v11 = vpop.xlane.xlu1 %3194  ;;  %3272 = vadd.xlane.f32.xlu1 %v3271_v15 }
 0x560   : > { %5198 = vpow2.f32 %v3245_v43  ;;  %v3251_v8 = vmul.f32 1.442695, %v3226_v38  ;;  %v3225_v0 = vsub.f32 %v5894_v3, %v3195_v11 }
 0x561   : > { %v5948_v4 = vpop.eup %5190  ;;  %v3204_v58 = vpop.xlane.xlu0 %3203 }
 0x562   : > { %5200 = vpow2.f32 %v3251_v8  ;;  %v3249_v46 = vmul.f32 1.442695, %v3225_v0  ;;  %v3228_v54 = vsub.f32 %v5900_v39, %v3204_v58  ;;  %v3274_v49 = vsel %vm1310_vm3, %v5948_v4, 0.0 }
 0x563   : > { %v3201_v53 = vpop.xlane.xlu1 %3200  ;;  %3275 = vadd.xlane.f32.xlu0 %v3274_v49 }
 0x564   : > { %5202 = vpow2.f32 %v3249_v46  ;;  %v3255_v22 = vmul.f32 1.442695, %v3228_v54  ;;  %v3227_v35 = vsub.f32 %v5904_v36, %v3201_v53 }
 0x565   : > { %v5954_v51 = vpop.eup %5192  ;;  %v3210_v10 = vpop.xlane.xlu0 %3209 }
 0x566   : > { %v5956_v3 = vpop.eup %5194  ;;  %5204 = vpow2.f32 %v3255_v22  ;;  %v3253_v16 = vmul.f32 1.442695, %v3227_v35  ;;  %v3230_v60 = vsub.f32 %v5906_v21, %v3210_v10  ;;  %v3280_v39 = vsel %vm1310_vm3, %v5954_v51, 0.0 }
 0x567   : > { %v3207_v56 = vpop.xlane.xlu1 %3206  ;;  %3281 = vadd.xlane.f32.xlu0 %v3280_v39  ;;  %v3277_v20 = vsel %vm1310_vm3, %v5956_v3, 0.0 }
 0x568   : > { %5206 = vpow2.f32 %v3253_v16  ;;  %v3259_v43 = vmul.f32 1.442695, %v3230_v60  ;;  %v3229_v36 = vsub.f32 %v5910_v28, %v3207_v56  ;;  %3278 = vadd.xlane.f32.xlu1 %v3277_v20 }
 0x569   : > { %v3216_v38 = vpop.xlane.xlu0 %3215 }
 0x56a   : > { %5208 = vpow2.f32 %v3259_v43  ;;  %v3257_v15 = vmul.f32 1.442695, %v3229_v36  ;;  %v3232_v11 = vsub.f32 %v5916_v44, %v3216_v38 }
 0x56b   : > { %v5965_v8 = vpop.eup %5196  ;;  %v3213_v21 = vpop.xlane.xlu1 %3212 }
 0x56c   : > { %5210 = vpow2.f32 %v3257_v15  ;;  %v3263_v0 = vmul.f32 1.442695, %v3232_v11  ;;  %v3231_v58 = vsub.f32 %v5920_v23, %v3213_v21  ;;  %v3286_v46 = vsel %vm1310_vm3, %v5965_v8, 0.0 }
 0x56d   : > { %v5970_v54 = vpop.eup %5198  ;;  %3287 = vadd.xlane.f32.xlu0 %v3286_v46 }
 0x56e   : > { %5212 = vpow2.f32 %v3263_v0  ;;  %v3261_v28 = vmul.f32 1.442695, %v3231_v58  ;;  %v3283_v49 = vsel %vm1310_vm3, %v5970_v54, 0.0 }
 0x56f   : > { %v5974_v53 = vpop.eup %5200  ;;  %3284 = vadd.xlane.f32.xlu1 %v3283_v49 }
 0x570   : > { %5214 = vpow2.f32 %v3261_v28  ;;  %v3292_v44 = vsel %vm1310_vm3, %v5974_v53, 0.0 }
 0x571   : > { %v5978_v22 = vpop.eup %5202  ;;  %3293 = vadd.xlane.f32.xlu0 %v3292_v44 }
 0x572   : > { %v3289_v23 = vsel %vm1310_vm3, %v5978_v22, 0.0 }
 0x573   : > { %v5982_v35 = vpop.eup %5204  ;;  %3290 = vadd.xlane.f32.xlu1 %v3289_v23 }
 0x574   : > { %v3298_v10 = vsel %vm1310_vm3, %v5982_v35, 0.0 }
 0x575   : > { %v5986_v16 = vpop.eup %5206  ;;  %3299 = vadd.xlane.f32.xlu0 %v3298_v10 }
 0x576   : > { %v3295_v60 = vsel %vm1310_vm3, %v5986_v16, 0.0 }
 0x577   : > { %v5990_v39 = vpop.eup %5208  ;;  %3296 = vadd.xlane.f32.xlu1 %v3295_v60 }
 0x578   : > { %v3304_v56 = vsel %vm1310_vm3, %v5990_v39, 0.0 }
 0x579   : > { %v5994_v20 = vpop.eup %5210  ;;  %3305 = vadd.xlane.f32.xlu0 %v3304_v56 }
 0x57a   : > { %v3301_v43 = vsel %vm1310_vm3, %v5994_v20, 0.0 }
 0x57b   : > { %v5998_v36 = vpop.eup %5212  ;;  %3302 = vadd.xlane.f32.xlu1 %v3301_v43 }
 0x57c   : > { %v3310_v38 = vsel %vm1310_vm3, %v5998_v36, 0.0 }
 0x57d   : > { %v6002_v15 = vpop.eup %5214  ;;  %3311 = vadd.xlane.f32.xlu0 %v3310_v38 }
 0x57e   : > { %v3307_v11 = vsel %vm1310_vm3, %v6002_v15, 0.0 }
 0x57f   : > { %3308 = vadd.xlane.f32.xlu1 %v3307_v11 }
 0x5de   : > { %v3270_v21 = vpop.xlane.xlu0 %3269 }
 0x5df   : > { %5216 = vrcp.f32 %v3270_v21 }
 0x5e0   : > { %v3267_v0 = vpop.xlane.xlu1 %3266 }
 0x5e1   : > { %5218 = vrcp.f32 %v3267_v0 }
 0x5e8   : > { %v3273_v58 = vpop.xlane.xlu1 %3272 }
 0x5e9   : > { %5220 = vrcp.f32 %v3273_v58 }
 0x5ec   : > { %v3276_v46 = vpop.xlane.xlu0 %3275  ;;  %v5217_v28 = vpop.eup %5216 }
 0x5ed   : > { %5222 = vrcp.f32 %v3276_v46  ;;  %v3316_v10 = vmul.f32 %v5217_v28, %v5930_v33 }
 0x5ee   : > { %v5219_v49 = vpop.eup %5218 }
 0x5ef   : > { %v3314_v44 = vmul.f32 %v5219_v49, %v5936_v47 }
 0x5f0   : > { %v3282_v23 = vpop.xlane.xlu0 %3281 }
 0x5f1   : > { %5224 = vrcp.f32 %v3282_v23  ;;  %v3279_v60 = vpop.xlane.xlu1 %3278  ;;  %5012 = vmatprep.mubr.msk.f32.mxu0 %vm1310_vm3, %v3314_v44 }
 0x5f2   : > { %5226 = vrcp.f32 %v3279_v60  ;;  %5013 = vmatmul.mubr.msk.f32.vlgmr.msra.gmra.mxu0 %vm1310_vm3, %v3316_v10 }
 0x5f3   : > { %5023 = vmatpush3.msra.mxu0 %v5843_v26 }
 0x5f4   : > { %5024 = vmatprep.subr.mxu0 %v5838_v40 }
 0x5f5   : > { %5025 = vmatpush3.msra.mxu0 %v5838_v40 }
 0x5f6   : > { %v5221_v56 = vpop.eup %5220  ;;  %5036 = vmatprep.subr.mxu0 %v5854_v41  ;;  %v3288_v47 = vpop.xlane.xlu0 %3287 }
 0x5f7   : > { %v3318_v43 = vmul.f32 %v5221_v56, %v5942_v52  ;;  %5228 = vrcp.f32 %v3288_v47 }
 0x5f8   : > { %v3285_v33 = vpop.xlane.xlu1 %3284 }
 0x5f9   : > { %5230 = vrcp.f32 %v3285_v33  ;;  %5019 = vmatprep.mubr.msk.f32.mxu1 %vm1310_vm3, %v3318_v43 }
 0x5fa   : > { %v5223_v38 = vpop.eup %5222  ;;  %v3294_v11 = vpop.xlane.xlu0 %3293 }
 0x5fb   : > { %v3320_v21 = vmul.f32 %v5223_v38, %v5948_v4  ;;  %5232 = vrcp.f32 %v3294_v11 }
 0x5fc   : > { %v3291_v26 = vpop.xlane.xlu1 %3290 }
 0x5fd   : > { %5234 = vrcp.f32 %v3291_v26  ;;  %5020 = vmatmul.mubr.msk.f32.vlgmr.msra.gmra.mxu1 %vm1310_vm3, %v3320_v21 }
 0x5fe   : > { %v5225_v40 = vpop.eup %5224  ;;  %5030 = vmatpush3.msra.mxu1 %v5840_v48  ;;  %v3300_v0 = vpop.xlane.xlu0 %3299 }
 0x5ff   : > { %v5227_v58 = vpop.eup %5226  ;;  %5031 = vmatprep.subr.mxu1 %v5836_v61  ;;  %v3324_v52 = vmul.f32 %v5225_v40, %v5954_v51  ;;  %5236 = vrcp.f32 %v3300_v0 }
 0x600   : > { %5032 = vmatpush3.msra.mxu1 %v5836_v61  ;;  %v3297_v46 = vpop.xlane.xlu1 %3296  ;;  %v3322_v4 = vmul.f32 %v5227_v58, %v5956_v3 }
 0x601   : > { %5043 = vmatprep.subr.mxu1 %v5850_v6  ;;  %5238 = vrcp.f32 %v3297_v46 }
 0x602   : > { %5026 = vmatprep.mubr.msk.f32.mxu0 %vm1310_vm3, %v3322_v4  ;;  %v3306_v28 = vpop.xlane.xlu0 %3305 }
 0x603   : > { %5027 = vmatmul.mubr.msk.f32.vlgmr.msra.gmra.mxu0 %vm1310_vm3, %v3324_v52  ;;  %5240 = vrcp.f32 %v3306_v28  ;;  %v6111_v28 = vld [vmem:[%s6175_s4] ss:$0 sm:$0xff] }
 0x604   : > { %5037 = vmatpush3.msra.mxu0 %v5854_v41  ;;  %v3303_v48 = vpop.xlane.xlu1 %3302  ;;  %v5229_v49 = vpop.eup %5228  ;;  %v260_v41 = vld [vmem:[%s6174_s3] sm:$0x3] }
 0x605   : > { %5038 = vmatprep.subr.mxu0 %v5848_v2  ;;  %5242 = vrcp.f32 %v3303_v48  ;;  %v3328_v23 = vmul.f32 %v5229_v49, %v5965_v8 }
 0x606   : > { %v5231_v61 = vpop.eup %5230  ;;  %5039 = vmatpush3.msra.mxu0 %v5848_v2  ;;  %v3312_v51 = vpop.xlane.xlu0 %3311  ;;  %v4008_v2 = vrot.slane %v260_v41, %v5322_v9 }
 0x607   : > { %5050 = vmatprep.subr.mxu0 %v5878_v42  ;;  %v3326_v3 = vmul.f32 %v5231_v61, %v5970_v54  ;;  %5244 = vrcp.f32 %v3312_v51 }
 0x608   : > { %v3309_v44 = vpop.xlane.xlu1 %3308  ;;  %v5233_v10 = vpop.eup %5232  ;;  %v4009_v43 = vrot.slane %v4008_v2, 1 }
 0x609   : > { %5246 = vrcp.f32 %v3309_v44  ;;  %5033 = vmatprep.mubr.msk.f32.mxu1 %vm1310_vm3, %v3326_v3  ;;  %v3332_v8 = vmul.f32 %v5233_v10, %v5974_v53 }
 0x60a   : > { %v5235_v60 = vpop.eup %5234  ;;  %5034 = vmatmul.mubr.msk.f32.vlgmr.msra.gmra.mxu1 %vm1310_vm3, %v3328_v23  ;;  %v4036_v24 = vsel %vm4034_vm4, %v4009_v43, 0 }
 0x60b   : > { %5044 = vmatpush3.msra.mxu1 %v5850_v6  ;;  %v3330_v54 = vmul.f32 %v5235_v60, %v5978_v22 }
 0x60c   : > { %5045 = vmatprep.subr.mxu1 %v5846_v55  ;;  %v5237_v56 = vpop.eup %5236 }
 0x60d   : > { %5046 = vmatpush3.msra.mxu1 %v5846_v55  ;;  %5040 = vmatprep.mubr.msk.f32.mxu0 %vm1310_vm3, %v3330_v54  ;;  %v3336_v6 = vmul.f32 %v5237_v56, %v5982_v35 }
 0x60e   : > { %v5239_v47 = vpop.eup %5238  ;;  %5057 = vmatprep.subr.mxu1 %v5872_v57  ;;  %5041 = vmatmul.mubr.msk.f32.vlgmr.msra.gmra.mxu0 %vm1310_vm3, %v3332_v8 }
 0x60f   : > { %5051 = vmatpush3.msra.mxu0 %v5878_v42  ;;  %v3334_v9 = vmul.f32 %v5239_v47, %v5986_v16 }
 0x610   : > { %5052 = vmatprep.subr.mxu0 %v5864_v45  ;;  %v5241_v53 = vpop.eup %5240 }
 0x611   : > { %5053 = vmatpush3.msra.mxu0 %v5864_v45  ;;  %5047 = vmatprep.mubr.msk.f32.mxu1 %vm1310_vm3, %v3334_v9  ;;  %v3340_v22 = vmul.f32 %v5241_v53, %v5990_v39 }
 0x612   : > { %v5243_v55 = vpop.eup %5242  ;;  %5048 = vmatmul.mubr.msk.f32.vlgmr.msra.gmra.mxu1 %vm1310_vm3, %v3336_v6  ;;  %5106 = vmatprep.subr.msk.bf16.mxu0 %vm4034_vm4, %v4009_v43 }
 0x613   : > { %5058 = vmatpush3.msra.mxu1 %v5872_v57  ;;  %v3338_v42 = vmul.f32 %v5243_v55, %v5994_v20  ;;  %v4160_v20 = vsel %vm4034_vm4, %v260_v41, 0 }
 0x614   : > { %5059 = vmatprep.subr.mxu1 %v5862_v27  ;;  %v5245_v35 = vpop.eup %5244 }
 0x615   : > { %5060 = vmatpush3.msra.mxu1 %v5862_v27  ;;  %5054 = vmatprep.mubr.msk.f32.mxu0 %vm1310_vm3, %v3338_v42  ;;  %v3344_v57 = vmul.f32 %v5245_v35, %v5998_v36 }
 0x616   : > { %v5247_v45 = vpop.eup %5246  ;;  %5055 = vmatmul.mubr.msk.f32.vlgmr.msra.gmra.mxu0 %vm1310_vm3, %v3340_v22  ;;  %5107 = vmatprep.subr.msk.bf16.mxu1 %vm4034_vm4, %v260_v41 }
 0x617   : > { %v3342_v16 = vmul.f32 %v5247_v45, %v6002_v15  ;;  %5065 = vmatpush3.bf16.msra.mxu0 %v4036_v24 }
 0x619   : > { %5061 = vmatprep.mubr.msk.f32.mxu1 %vm1310_vm3, %v3342_v16 }
 0x61a   : > { %5062 = vmatmul.mubr.msk.f32.vlgmr.msra.gmra.mxu1 %vm1310_vm3, %v3344_v57 }
 0x61b   : > { %5083 = vmatpush3.bf16.msra.mxu1 %v4160_v20  ;;  %5084 = vmatprep.mubr.msk.bf16.mxu1 %vm597_vm2, %v2135_v18  ;;  %v6179_v18 = vpack.c.bf16 %v5783_v12, %v5785_v14 }
 0x61e   : > { %5085 = vmatmul.mubr.msk.bf16.vlgmr.msra.gmra.mxu1 %vm597_vm2, %v2136_v25 }
 0x61f   : > { %5088 = vmatprep.mubr.msk.bf16.mxu1 %vm597_vm2, %v2137_v34 }
 0x626   : > { %5089 = vmatmul.mubr.msk.bf16.gmra.mxu1 %vm597_vm2, %v2138_v32 }
 0x627   : > { %5092 = vmatprep.mubr.msk.bf16.mxu1 %vm597_vm2, %v2139_v29 }
 0x62e   : > { %5093 = vmatmul.mubr.msk.bf16.gmra.mxu1 %vm597_vm2, %v6177_v13 }
 0x62f   : > { %5096 = vmatprep.mubr.msk.bf16.mxu1 %vm597_vm2, %v6178_v17 }
 0x636   : > { %5097 = vmatmul.mubr.msk.bf16.gmra.mxu1 %vm597_vm2, %v6179_v18 }
 0x6b2   : > { %v5014_v50 = vpop.f32.mrf.mxu0 }
 0x6b4   : > { %v3417_v25 = vpop.f32.mrf.mxu0 }
 0x6b5   : > { %v3993_v30 = vpack.c.bf16 %v5014_v50, %v3417_v25 }
 0x6b7   : > { %5066 = vmatprep.mubr.msk.bf16.mxu0 %vm597_vm2, %v3993_v30 }
 0x6bd   : > { %v5021_v31 = vpop.f32.mrf.mxu1 }
 0x6bf   : > { %v3498_v34 = vpop.f32.mrf.mxu1 }
 0x6c0   : > { %v3994_v59 = vpack.c.bf16 %v5021_v31, %v3498_v34 }
 0x6c2   : > { %5067 = vmatmul.mubr.msk.bf16.vlgmr.msra.gmra.mxu0 %vm597_vm2, %v3994_v59 }
 0x6c3   : > { %v5028_v62 = vpop.f32.mrf.mxu0 }
 0x6c5   : > { %v3579_v7 = vpop.f32.mrf.mxu0 }
 0x6c6   : > { %v3995_v32 = vpack.c.bf16 %v5028_v62, %v3579_v7 }
 0x6c8   : > { %5070 = vmatprep.mubr.msk.bf16.mxu0 %vm597_vm2, %v3995_v32 }
 0x6ca   : > { %v5035_v63 = vpop.f32.mrf.mxu1 }
 0x6cc   : > { %v3660_v29 = vpop.f32.mrf.mxu1 }
 0x6cd   : > { %v3996_v1 = vpack.c.bf16 %v5035_v63, %v3660_v29 }
 0x6ce   : > { %v5042_v37 = vpop.f32.mrf.mxu0 }
 0x6cf   : > { %5071 = vmatmul.mubr.msk.bf16.gmra.mxu0 %vm597_vm2, %v3996_v1 }
 0x6d0   : > { %v3741_v19 = vpop.f32.mrf.mxu0 }
 0x6d1   : > { %v3997_v5 = vpack.c.bf16 %v5042_v37, %v3741_v19 }
 0x6d2   : > { %v5049_v12 = vpop.f32.mrf.mxu1 }
 0x6d3   : > { %5074 = vmatprep.mubr.msk.bf16.mxu0 %vm597_vm2, %v3997_v5 }
 0x6d4   : > { %v3822_v14 = vpop.f32.mrf.mxu1 }
 0x6d5   : > { %v3998_v27 = vpack.c.bf16 %v5049_v12, %v3822_v14 }
 0x6d6   : > { %v5056_v39 = vpop.f32.mrf.mxu0 }
 0x6d7   : > { %5075 = vmatmul.mubr.msk.bf16.gmra.mxu0 %vm597_vm2, %v3998_v27 }
 0x6d8   : > { %v3903_v36 = vpop.f32.mrf.mxu0 }
 0x6d9   : > { %v3999_v15 = vpack.c.bf16 %v5056_v39, %v3903_v36 }
 0x6da   : > { %v5063_v33 = vpop.f32.mrf.mxu1 }
 0x6db   : > { %5078 = vmatprep.mubr.msk.bf16.mxu0 %vm597_vm2, %v3999_v15 }
 0x6dc   : > { %v3984_v38 = vpop.f32.mrf.mxu1 }
 0x6dd   : > { %v4000_v11 = vpack.c.bf16 %v5063_v33, %v3984_v38 }
 0x6de   : > { %v5086_v21 = vpop.f32.mrf.mxu1 }
 0x6df   : > { %5079 = vmatmul.mubr.msk.bf16.gmra.mxu0 %vm597_vm2, %v4000_v11 }
 0x6e0   : > { %v4196_v26 = vpop.f32.mrf.mxu1 }
 0x6e2   : > { %v5087_v40 = vpop.f32.mrf.mxu1 }
 0x6e4   : > { %v4199_v0 = vpop.f32.mrf.mxu1 }
 0x6e6   : > { %v5090_v58 = vpop.f32.mrf.mxu1 }
 0x6e8   : > { %v4212_v52 = vpop.f32.mrf.mxu1 }
 0x6ea   : > { %v5091_v46 = vpop.f32.mrf.mxu1 }
 0x6ec   : > { %v4215_v61 = vpop.f32.mrf.mxu1 }
 0x6ee   : > { %v5094_v60 = vpop.f32.mrf.mxu1 }
 0x6f0   : > { %v4228_v56 = vpop.f32.mrf.mxu1 }
 0x6f2   : > { %v5095_v9 = vpop.f32.mrf.mxu1 }
 0x6f4   : > { %v4231_v45 = vpop.f32.mrf.mxu1 }
 0x6f6   : > { %v5098_v24 = vpop.f32.mrf.mxu1 }
 0x6f8   : > { %v4244_v62 = vpop.f32.mrf.mxu1 }
 0x6fa   : > { %v5099_v19 = vpop.f32.mrf.mxu1 }
 0x6fc   : > { %v4247_v15 = vpop.f32.mrf.mxu1 }
 0x782   : > { %v5068_v4 = vpop.f32.mrf.mxu0 }
 0x783   : > { %v4205_v48 = vadd.f32 %v5086_v21, %v5068_v4 }
 0x784   : > { %v4072_v49 = vpop.f32.mrf.mxu0 }
 0x785   : > { %v4268_v51 = vadd.f32 %v6111_v28, %v4205_v48  ;;  %v4197_v3 = vadd.f32 %v4196_v26, %v4072_v49 }
 0x786   : > { %v5069_v44 = vpop.f32.mrf.mxu0 }
 0x787   : > { %4284 = vst.msk [vmem:[%s6118_s13 + $0x10] sm:$0xff] %vm261_vm1, %v4268_v51  ;;  %v4266_v23 = vadd.f32 %v6111_v28, %v4197_v3  ;;  %v4208_v10 = vadd.f32 %v5087_v40, %v5069_v44 }
 0x788   : > { %v4075_v41 = vpop.f32.mrf.mxu0 }
 0x789   : > { %4282 = vst.msk [vmem:[%s6118_s13] sm:$0xff] %vm261_vm1, %v4266_v23  ;;  %v4269_v2 = vadd.f32 %v6111_v28, %v4208_v10  ;;  %v4200_v54 = vadd.f32 %v4199_v0, %v4075_v41 }
 0x78b   : > { %4285 = vst.msk [vmem:[%s6118_s13 + $0x18] sm:$0xff] %vm261_vm1, %v4269_v2  ;;  %v4267_v8 = vadd.f32 %v6111_v28, %v4200_v54 }
 0x78d   : > { %4283 = vst.msk [vmem:[%s6118_s13 + $0x8] sm:$0xff] %vm261_vm1, %v4267_v8 }
 0x78f   : > { %v5072_v47 = vpop.f32.mrf.mxu0 }
 0x790   : > { %v4221_v43 = vadd.f32 %v5090_v58, %v5072_v47 }
 0x791   : > { %v4088_v6 = vpop.f32.mrf.mxu0 }
 0x792   : > { %v4272_v53 = vadd.f32 %v6111_v28, %v4221_v43  ;;  %v4213_v55 = vadd.f32 %v4212_v52, %v4088_v6 }
 0x793   : > { %v5073_v42 = vpop.f32.mrf.mxu0 }
 0x794   : > { %4288 = vst.msk [vmem:[%s6118_s13 + $0x30] sm:$0xff] %vm261_vm1, %v4272_v53  ;;  %v4270_v22 = vadd.f32 %v6111_v28, %v4213_v55  ;;  %v4224_v35 = vadd.f32 %v5091_v46, %v5073_v42 }
 0x795   : > { %v4091_v16 = vpop.f32.mrf.mxu0 }
 0x796   : > { %4286 = vst.msk [vmem:[%s6118_s13 + $0x20] sm:$0xff] %vm261_vm1, %v4270_v22  ;;  %v4273_v57 = vadd.f32 %v6111_v28, %v4224_v35  ;;  %v4216_v20 = vadd.f32 %v4215_v61, %v4091_v16 }
 0x797   : > { %v5076_v13 = vpop.f32.mrf.mxu0 }
 0x798   : > { %4289 = vst.msk [vmem:[%s6118_s13 + $0x38] sm:$0xff] %vm261_vm1, %v4273_v57  ;;  %v4271_v17 = vadd.f32 %v6111_v28, %v4216_v20  ;;  %v4237_v18 = vadd.f32 %v5094_v60, %v5076_v13 }
 0x799   : > { %v4104_v50 = vpop.f32.mrf.mxu0 }
 0x79a   : > { %4287 = vst.msk [vmem:[%s6118_s13 + $0x28] sm:$0xff] %vm261_vm1, %v4271_v17  ;;  %v4276_v25 = vadd.f32 %v6111_v28, %v4237_v18  ;;  %v4229_v30 = vadd.f32 %v4228_v56, %v4104_v50 }
 0x79b   : > { %v5077_v31 = vpop.f32.mrf.mxu0 }
 0x79c   : > { %4292 = vst.msk [vmem:[%s6118_s13 + $0x50] sm:$0xff] %vm261_vm1, %v4276_v25  ;;  %v4274_v34 = vadd.f32 %v6111_v28, %v4229_v30  ;;  %v4240_v59 = vadd.f32 %v5095_v9, %v5077_v31 }
 0x79d   : > { %v4107_v7 = vpop.f32.mrf.mxu0 }
 0x79e   : > { %4290 = vst.msk [vmem:[%s6118_s13 + $0x40] sm:$0xff] %vm261_vm1, %v4274_v34  ;;  %v4277_v32 = vadd.f32 %v6111_v28, %v4240_v59  ;;  %v4232_v63 = vadd.f32 %v4231_v45, %v4107_v7 }
 0x79f   : > { %v5080_v29 = vpop.f32.mrf.mxu0 }
 0x7a0   : > { %4293 = vst.msk [vmem:[%s6118_s13 + $0x58] sm:$0xff] %vm261_vm1, %v4277_v32  ;;  %v4275_v1 = vadd.f32 %v6111_v28, %v4232_v63  ;;  %v4253_v37 = vadd.f32 %v5098_v24, %v5080_v29 }
 0x7a1   : > { %v4120_v5 = vpop.f32.mrf.mxu0 }
 0x7a2   : > { %4291 = vst.msk [vmem:[%s6118_s13 + $0x48] sm:$0xff] %vm261_vm1, %v4275_v1  ;;  %v4280_v12 = vadd.f32 %v6111_v28, %v4253_v37  ;;  %v4245_v14 = vadd.f32 %v4244_v62, %v4120_v5 }
 0x7a3   : > { %v5081_v27 = vpop.f32.mrf.mxu0 }
 0x7a4   : > { %4296 = vst.msk [vmem:[%s6118_s13 + $0x70] sm:$0xff] %vm261_vm1, %v4280_v12  ;;  %v4278_v39 = vadd.f32 %v6111_v28, %v4245_v14  ;;  %v4256_v36 = vadd.f32 %v5099_v19, %v5081_v27 }
 0x7a5   : > { %v4123_v33 = vpop.f32.mrf.mxu0 }
 0x7a6   : > { %4294 = vst.msk [vmem:[%s6118_s13 + $0x60] sm:$0xff] %vm261_vm1, %v4278_v39  ;;  %v4281_v38 = vadd.f32 %v6111_v28, %v4256_v36  ;;  %v4248_v11 = vadd.f32 %v4247_v15, %v4123_v33 }
 0x7a8   : > { %4297 = vst.msk [vmem:[%s6118_s13 + $0x78] sm:$0xff] %vm261_vm1, %v4281_v38  ;;  %v4279_v21 = vadd.f32 %v6111_v28, %v4248_v11 }
 0x7aa   : > { %4295 = vst.msk [vmem:[%s6118_s13 + $0x68] sm:$0xff] %vm261_vm1, %v4279_v21 }
 0x7ab PF: > { %s15_s18 = sadd.s32 1, %s5254_s18  }
 0x7ac   : > { %p12_p4 = scmp.ge.s32.totalorder %s15_s18, 6  }
 0x7ae   :  { %14 = sbr.rel (!%p12_p4) target bundleno = 1 (0x1), region = 70 }

</bundles_post_ra>
